<compile_context>
chip_gen: v5e
topology: v5e:2x2
jax: 0.10.0
libtpu: 0.0.40
codegen_flags: <defaults>
</compile_context>

<pallas_src>
import jax
import jax.numpy as jnp
import numpy as np
from jax import lax
from jax.experimental import pallas as pl
from jax.experimental.pallas import tpu as pltpu

EMB = 32            # EMB_SIZE in the PyTorch module
NEG_SLOPE = 0.01    # nn.LeakyReLU default
EDGE_CHUNK = 128    # edges per masked-max tile (lane axis, 128-aligned)
NODE_BLOCK = 8      # nodes per masked-max tile (sublane granularity)
NEG_INF = -1e30


def _leaky(z):
    return jnp.where(z > 0, z, NEG_SLOPE * z)


def _mmp_kernel(
    # structure + initial state (VMEM)
    x_in, xg_in, src_t, tgt_bias, gmask, n2g, has_in,
    # per-step parameters, fully VMEM-resident [steps, ...]
    w_mess, b_mess, w_agg, b_agg, w_gf, b_feat, w_tr, b_tr,
    # scalar gate bias per step (SMEM)
    b_gate,
    # outputs
    x_out, xg_out,
):
    N, D = x_in.shape
    G = xg_in.shape[0]
    e_pad = src_t.shape[1]
    steps = w_mess.shape[0]
    n_chunks = e_pad // EDGE_CHUNK
    n_blocks = N // NODE_BLOCK

    # Step-invariant loads / precompute, hoisted out of the steps loop.
    gm = gmask[...]                       # [G, N] 0/1 f32
    gbias = (gm - 1.0) * 1e30             # 0 for members, -1e30 otherwise
    n2g_f = n2g[...]                      # [N, G] 0/1 f32
    hin = has_in[...]                     # [N, 1] f32
    src = src_t[...]                      # [N, E_pad] one-hot "source of edge e"
    x = x_in[...]                         # [N, D]
    xg = xg_in[...]                       # [G, D]

    for s in range(steps):                # static (unrolled) steps loop
        # ---------------- GraphNet step (message + aggr='max') ----------------
        # edge_size == 0 => cat([x_j, edge_attr]) == x_j. Fold the message bias into the
        # dense matmul, then gather per-edge messages lane-dense: [D, E_pad], edges on lanes.
        xwb = jnp.dot(x, w_mess[s], preferred_element_type=jnp.float32) + b_mess[s]
        msg = _leaky(lax.dot_general(                     # contract the node axis of both
            xwb, src, (((0,), (0,)), ((), ())),
            preferred_element_type=jnp.float32))          # [D, E_pad]

        # Masked max over incoming edges, tiled [NODE_BLOCK, D, EDGE_CHUNK]: add the
        # precomputed additive target bias (0 / -1e30) and reduce over the lane axis.
        blocks = []
        for nb in range(n_blocks):                        # static node-block loop
            r0 = nb * NODE_BLOCK
            acc = jnp.full((NODE_BLOCK, D), NEG_INF, jnp.float32)
            for c in range(n_chunks):                     # static edge-chunk loop
                off = c * EDGE_CHUNK
                bias_blk = tgt_bias[r0:r0 + NODE_BLOCK, off:off + EDGE_CHUNK]  # [NB, EC]
                msg_c = msg[:, off:off + EDGE_CHUNK]                            # [D, EC]
                masked = bias_blk[:, None, :] + msg_c[None, :, :]               # [NB, D, EC]
                acc = jnp.maximum(acc, jnp.max(masked, axis=-1))                # [NB, D]
            blocks.append(acc)
        aggr = blocks[0] if n_blocks == 1 else jnp.concatenate(blocks, axis=0)  # [N, D]
        aggr = jnp.where(hin > 0.5, aggr, 0.0)            # nodes without in-edges -> 0

        xg_node = jnp.dot(n2g_f, xg, preferred_element_type=jnp.float32)        # [N, D]
        cat = jnp.concatenate([x, xg_node, aggr], axis=-1)                       # [N, 3D]
        x = _leaky(jnp.dot(cat, w_agg[s], preferred_element_type=jnp.float32)
                   + b_agg[s]) + x                                               # [N, D]

        # ---------------- GlobalNode step (GlobalAttention pooling) ----------------
        # gate + feat Linears fused into one [D, D+1] matmul (feat first, gate last col).
        gf = jnp.dot(x, w_gf[s], preferred_element_type=jnp.float32)             # [N, D+1]
        feat = _leaky(gf[:, :D] + b_feat[s])                                     # [N, D]
        gate = gf[:, D:D + 1] + b_gate[s]                                        # [N, 1]
        # segment softmax with a per-graph max (matches torch_geometric.utils.softmax)
        m_g = jnp.max(gbias[:, :, None] + gate[None, :, :], axis=1)              # [G, 1]
        e = jnp.exp(gate - jnp.dot(n2g_f, m_g, preferred_element_type=jnp.float32))
        # one fused segment sum: numerator columns + denominator as the last column
        gsum = jnp.dot(gm, jnp.concatenate([e * feat, e], axis=-1),
                       preferred_element_type=jnp.float32)                       # [G, D+1]
        xg_att = gsum[:, :D] / gsum[:, D:D + 1]                                  # [G, D]
        xg_cat = jnp.concatenate([xg_att, xg], axis=-1)                          # [G, 2D]
        xg = _leaky(jnp.dot(xg_cat, w_tr[s], preferred_element_type=jnp.float32)
                    + b_tr[s]) + xg                                              # [G, D]

    x_out[...] = x
    xg_out[...] = xg


def multi_message_passing(x, x_global, src, tgt, batch_ind, num_graphs, params):
    N, D = x.shape
    G = int(num_graphs)
    E = int(src.shape[0])
    steps = int(params["w_mess"].shape[0])

    n_pad = ((N + NODE_BLOCK - 1) // NODE_BLOCK) * NODE_BLOCK
    e_pad = ((E + EDGE_CHUNK - 1) // EDGE_CHUNK) * EDGE_CHUNK

    # ---- plain-JAX glue (layout plumbing, built once per graph batch) ----
    # one-hot "source node of edge e", node-major: [N_pad, E_pad] f32 (exact 0/1)
    src_t = jnp.zeros((n_pad, e_pad), jnp.float32).at[src, jnp.arange(E)].set(1.0)
    # additive target mask: 0 where tgt[e]==n, -1e30 elsewhere (incl. padded edges/nodes)
    tgt_oh = jnp.zeros((n_pad, e_pad), jnp.float32).at[tgt, jnp.arange(E)].set(1.0)
    tgt_bias = (tgt_oh - 1.0) * 1e30
    gmask = jnp.zeros((G, n_pad), jnp.float32).at[batch_ind, jnp.arange(N)].set(1.0)
    n2g = gmask.T
    has_in = (jnp.zeros((n_pad,), jnp.float32).at[tgt].add(1.0) > 0
              ).astype(jnp.float32).reshape(n_pad, 1)
    x_p = jnp.zeros((n_pad, D), jnp.float32).at[:N, :].set(x)
    # fused attention weight: feat columns first, gate as the last column
    w_gf = jnp.concatenate([params["w_feat"], params["w_gate"]], axis=-1)  # [steps, D, D+1]

    # explicit scoped-VMEM budget for the all-resident design (review item)
    param_elems = steps * (D * D + D + 3 * D * D + D + D * (D + 1) + D
                           + 2 * D * D + D + 1)
    resident = (2 * n_pad * e_pad + 2 * G * n_pad + n_pad
                + 2 * n_pad * D + 2 * G * D + param_elems)
    transient = (D * e_pad + 2 * NODE_BLOCK * D * EDGE_CHUNK
                 + 8 * n_pad * D + 8 * G * D)
    vmem_limit = int(min(max(8 * (resident + transient), 16 << 20), 64 << 20))

    vmem = lambda: pl.BlockSpec(memory_space=pltpu.MemorySpace.VMEM)
    smem = lambda: pl.BlockSpec(memory_space=pltpu.MemorySpace.SMEM)
    in_specs = [vmem() for _ in range(15)] + [smem()]

    x_out, xg_out = pl.pallas_call(
        _mmp_kernel,
        out_shape=(jax.ShapeDtypeStruct((n_pad, D), jnp.float32),
                   jax.ShapeDtypeStruct((G, D), jnp.float32)),
        in_specs=in_specs,
        out_specs=(vmem(), vmem()),
        compiler_params=pltpu.CompilerParams(vmem_limit_bytes=vmem_limit),
    )(x_p, x_global, src_t, tgt_bias, gmask, n2g, has_in,
      params["w_mess"], params["b_mess"], params["w_agg"], params["b_agg"],
      w_gf, params["b_feat"], params["w_tr"], params["b_tr"],
      params["b_gate"])
    return x_out[:N], xg_out


# ---------------- pure-JAX reference (matches the PyTorch forward) ----------------
def reference(x, xg, src, tgt, batch, params, steps, num_graphs):
    N, D = x.shape
    for s in range(steps):
        xg_node = xg[batch]
        msg = _leaky(x[src] @ params["w_mess"][s] + params["b_mess"][s][0])
        aggr = jnp.full((N, D), -1e30, jnp.float32).at[tgt].max(msg)
        has_in = jnp.zeros((N,), jnp.float32).at[tgt].add(1.0)
        aggr = jnp.where(has_in[:, None] > 0, aggr, 0.0)
        z = (jnp.concatenate([x, xg_node, aggr], axis=1) @ params["w_agg"][s]
             + params["b_agg"][s][0])
        x = _leaky(z) + x

        gate = x @ params["w_gate"][s] + params["b_gate"][s]                # [N, 1]
        feat = _leaky(x @ params["w_feat"][s] + params["b_feat"][s][0])
        m = jnp.full((num_graphs, 1), -jnp.inf, jnp.float32).at[batch].max(gate)
        e = jnp.exp(gate - m[batch])
        denom = jnp.zeros((num_graphs, 1), jnp.float32).at[batch].add(e)
        att = e / denom[batch]
        xg_att = jnp.zeros((num_graphs, D), jnp.float32).at[batch].add(att * feat)
        xg = _leaky(jnp.concatenate([xg_att, xg], axis=1) @ params["w_tr"][s]
                    + params["b_tr"][s][0]) + xg
    return x, xg


def make_params(key, steps, D):
    ks = jax.random.split(key, 10)
    r = lambda k, shape: 0.1 * jax.random.normal(k, shape, jnp.float32)
    return dict(
        # f_mess: Linear(node_in + edge(=0), agg) + LeakyReLU
        w_mess=r(ks[0], (steps, D, D)), b_mess=r(ks[1], (steps, 1, D)),
        # f_agg: Linear(node_in + global + agg, node_out), fused (3D, D) block
        w_agg=r(ks[2], (steps, 3 * D, D)), b_agg=r(ks[3], (steps, 1, D)),
        # GlobalAttention: gate Linear(D,1) (column + scalar bias), feat Linear(D,D)
        w_gate=r(ks[4], (steps, D, 1)), b_gate=r(ks[5], (steps,)),
        w_feat=r(ks[6], (steps, D, D)), b_feat=r(ks[7], (steps, 1, D)),
        # transform: Linear(2*global, global), fused (2D, D) block
        w_tr=r(ks[8], (steps, 2 * D, D)), b_tr=r(ks[9], (steps, 1, D)),
    )


if __name__ == "__main__":
    steps = 2
    D = EMB
    num_graphs = 2
    nodes_per_graph = 8
    N = num_graphs * nodes_per_graph

    # Bidirectional ring inside each graph (every node has incoming edges).
    src_list, tgt_list = [], []
    for g in range(num_graphs):
        base = g * nodes_per_graph
        for i in range(nodes_per_graph):
            j = (i + 1) % nodes_per_graph
            src_list += [base + i, base + j]
            tgt_list += [base + j, base + i]
    src = jnp.asarray(src_list, jnp.int32)
    tgt = jnp.asarray(tgt_list, jnp.int32)
    batch_ind = jnp.asarray(
        np.repeat(np.arange(num_graphs), nodes_per_graph), jnp.int32)
    # edge_size == 0 in the PyTorch module: cat([x_j, edge_attr]) == x_j (no edge features).

    key = jax.random.PRNGKey(0)
    kx, kg, kp = jax.random.split(key, 3)
    x = jax.random.normal(kx, (N, D), jnp.float32)
    x_global = jax.random.normal(kg, (num_graphs, D), jnp.float32)
    params = make_params(kp, steps, D)

    x_out, xg_out = multi_message_passing(
        x, x_global, src, tgt, batch_ind, num_graphs, params)
    jax.block_until_ready((x_out, xg_out))

    x_ref, xg_ref = reference(x, x_global, src, tgt, batch_ind, params, steps, num_graphs)
    np.testing.assert_allclose(np.asarray(x_out), np.asarray(x_ref), rtol=1e-4, atol=1e-4)
    np.testing.assert_allclose(np.asarray(xg_out), np.asarray(xg_ref), rtol=1e-4, atol=1e-4)

    print("KERNEL_OK")
</pallas_src>

<mosaic_0001>
module attributes {stable_mosaic.version = 11 : i64} {
  func.func @_mmp_kernel(%arg0: memref<16x32xf32, #tpu.memory_space<vmem>>, %arg1: memref<2x32xf32, #tpu.memory_space<vmem>>, %arg2: memref<16x128xf32, #tpu.memory_space<vmem>>, %arg3: memref<16x128xf32, #tpu.memory_space<vmem>>, %arg4: memref<2x16xf32, #tpu.memory_space<vmem>>, %arg5: memref<16x2xf32, #tpu.memory_space<vmem>>, %arg6: memref<16x1xf32, #tpu.memory_space<vmem>>, %arg7: memref<2x32x32xf32, #tpu.memory_space<vmem>>, %arg8: memref<2x1x32xf32, #tpu.memory_space<vmem>>, %arg9: memref<2x96x32xf32, #tpu.memory_space<vmem>>, %arg10: memref<2x1x32xf32, #tpu.memory_space<vmem>>, %arg11: memref<2x32x33xf32, #tpu.memory_space<vmem>>, %arg12: memref<2x1x32xf32, #tpu.memory_space<vmem>>, %arg13: memref<2x64x32xf32, #tpu.memory_space<vmem>>, %arg14: memref<2x1x32xf32, #tpu.memory_space<vmem>>, %arg15: memref<2xf32, #tpu.memory_space<smem>>, %arg16: memref<16x32xf32, #tpu.memory_space<vmem>>, %arg17: memref<2x32xf32, #tpu.memory_space<vmem>>) attributes {dimension_semantics = [], scalar_prefetch = 0 : i64, scratch_operands = 0 : i64, tpu.core_type = #tpu.core_type<tc>} {
    %c0 = arith.constant 0 : index
    %c0_0 = arith.constant 0 : index
    %0 = vector.load %arg4[%c0, %c0_0] : memref<2x16xf32, #tpu.memory_space<vmem>>, vector<2x16xf32>
    %cst = arith.constant 1.000000e+00 : f32
    %1 = vector.broadcast %cst : f32 to vector<2x16xf32>
    %2 = arith.subf %0, %1 : vector<2x16xf32>
    %cst_1 = arith.constant 1.000000e+30 : f32
    %3 = vector.broadcast %cst_1 : f32 to vector<2x16xf32>
    %4 = arith.mulf %2, %3 : vector<2x16xf32>
    %c0_2 = arith.constant 0 : index
    %c0_3 = arith.constant 0 : index
    %5 = vector.load %arg5[%c0_2, %c0_3] : memref<16x2xf32, #tpu.memory_space<vmem>>, vector<16x2xf32>
    %c0_4 = arith.constant 0 : index
    %c0_5 = arith.constant 0 : index
    %6 = vector.load %arg6[%c0_4, %c0_5] : memref<16x1xf32, #tpu.memory_space<vmem>>, vector<16x1xf32>
    %c0_6 = arith.constant 0 : index
    %c0_7 = arith.constant 0 : index
    %7 = vector.load %arg2[%c0_6, %c0_7] : memref<16x128xf32, #tpu.memory_space<vmem>>, vector<16x128xf32>
    %c0_8 = arith.constant 0 : index
    %c0_9 = arith.constant 0 : index
    %8 = vector.load %arg0[%c0_8, %c0_9] : memref<16x32xf32, #tpu.memory_space<vmem>>, vector<16x32xf32>
    %c0_10 = arith.constant 0 : index
    %c0_11 = arith.constant 0 : index
    %9 = vector.load %arg1[%c0_10, %c0_11] : memref<2x32xf32, #tpu.memory_space<vmem>>, vector<2x32xf32>
    %c0_12 = arith.constant 0 : index
    %c0_13 = arith.constant 0 : index
    %c0_14 = arith.constant 0 : index
    %10 = vector.load %arg7[%c0_12, %c0_13, %c0_14] : memref<2x32x32xf32, #tpu.memory_space<vmem>>, vector<1x32x32xf32>
    %11 = vector.shape_cast %10 : vector<1x32x32xf32> to vector<32x32xf32>
    %cst_15 = arith.constant dense<0.000000e+00> : vector<16x32xf32>
    %12 = tpu.matmul %8, %11, %cst_15 {dimension_numbers = #tpu.dot_dimension_numbers<[1], [0], [0], [1], [0, 0, 1, 1], [], []>} : vector<16x32xf32>, vector<32x32xf32>, vector<16x32xf32> -> vector<16x32xf32>
    %c0_16 = arith.constant 0 : index
    %c0_17 = arith.constant 0 : index
    %c0_18 = arith.constant 0 : index
    %13 = vector.load %arg8[%c0_16, %c0_17, %c0_18] : memref<2x1x32xf32, #tpu.memory_space<vmem>>, vector<1x1x32xf32>
    %14 = vector.shape_cast %13 : vector<1x1x32xf32> to vector<1x32xf32>
    %15 = vector.broadcast %14 : vector<1x32xf32> to vector<16x32xf32>
    %16 = arith.addf %12, %15 : vector<16x32xf32>
    %cst_19 = arith.constant dense<0.000000e+00> : vector<32x128xf32>
    %17 = tpu.matmul %16, %7, %cst_19 {dimension_numbers = #tpu.dot_dimension_numbers<[0], [0], [1], [1], [0, 1, 1, 1], [], []>} : vector<16x32xf32>, vector<16x128xf32>, vector<32x128xf32> -> vector<32x128xf32>
    %cst_20 = arith.constant 0.000000e+00 : f32
    %18 = vector.broadcast %cst_20 : f32 to vector<32x128xf32>
    %19 = arith.cmpf ogt, %17, %18 : vector<32x128xf32>
    %cst_21 = arith.constant 0.00999999977 : f32
    %20 = vector.broadcast %cst_21 : f32 to vector<32x128xf32>
    %21 = arith.mulf %20, %17 : vector<32x128xf32>
    %22 = arith.select %19, %17, %21 : vector<32x128xi1>, vector<32x128xf32>
    %cst_22 = arith.constant -1.000000e+30 : f32
    %23 = vector.broadcast %cst_22 : f32 to vector<8x32xf32>
    %c0_23 = arith.constant 0 : index
    %c0_24 = arith.constant 0 : index
    %24 = vector.load %arg3[%c0_23, %c0_24] : memref<16x128xf32, #tpu.memory_space<vmem>>, vector<8x128xf32>
    %25 = vector.shape_cast %24 : vector<8x128xf32> to vector<8x1x128xf32>
    %26 = vector.shape_cast %22 : vector<32x128xf32> to vector<1x32x128xf32>
    %27 = vector.broadcast %25 : vector<8x1x128xf32> to vector<8x32x128xf32>
    %28 = vector.broadcast %26 : vector<1x32x128xf32> to vector<8x32x128xf32>
    %29 = arith.addf %27, %28 : vector<8x32x128xf32>
    %cst_25 = arith.constant dense<0xFF800000> : vector<8x32xf32>
    %30 = vector.multi_reduction <maximumf>, %29, %cst_25 [2] : vector<8x32x128xf32> to vector<8x32xf32>
    %31 = arith.maximumf %23, %30 : vector<8x32xf32>
    %cst_26 = arith.constant -1.000000e+30 : f32
    %32 = vector.broadcast %cst_26 : f32 to vector<8x32xf32>
    %c8 = arith.constant 8 : index
    %c0_27 = arith.constant 0 : index
    %33 = vector.load %arg3[%c8, %c0_27] : memref<16x128xf32, #tpu.memory_space<vmem>>, vector<8x128xf32>
    %34 = vector.shape_cast %33 : vector<8x128xf32> to vector<8x1x128xf32>
    %35 = vector.shape_cast %22 : vector<32x128xf32> to vector<1x32x128xf32>
    %36 = vector.broadcast %34 : vector<8x1x128xf32> to vector<8x32x128xf32>
    %37 = vector.broadcast %35 : vector<1x32x128xf32> to vector<8x32x128xf32>
    %38 = arith.addf %36, %37 : vector<8x32x128xf32>
    %cst_28 = arith.constant dense<0xFF800000> : vector<8x32xf32>
    %39 = vector.multi_reduction <maximumf>, %38, %cst_28 [2] : vector<8x32x128xf32> to vector<8x32xf32>
    %40 = arith.maximumf %32, %39 : vector<8x32xf32>
    %41 = tpu.concatenate %31, %40 in 0 : vector<8x32xf32>, vector<8x32xf32> -> vector<16x32xf32>
    %cst_29 = arith.constant 5.000000e-01 : f32
    %42 = vector.broadcast %cst_29 : f32 to vector<16x1xf32>
    %43 = arith.cmpf ogt, %6, %42 : vector<16x1xf32>
    %cst_30 = arith.constant 0.000000e+00 : f32
    %44 = vector.shape_cast %43 : vector<16x1xi1> to vector<16x1xi1>
    %45 = vector.broadcast %44 : vector<16x1xi1> to vector<16x32xi1>
    %46 = vector.broadcast %cst_30 : f32 to vector<16x32xf32>
    %47 = arith.select %45, %41, %46 : vector<16x32xi1>, vector<16x32xf32>
    %cst_31 = arith.constant dense<0.000000e+00> : vector<16x32xf32>
    %48 = tpu.matmul %5, %9, %cst_31 {dimension_numbers = #tpu.dot_dimension_numbers<[1], [0], [0], [1], [0, 0, 1, 1], [], []>} : vector<16x2xf32>, vector<2x32xf32>, vector<16x32xf32> -> vector<16x32xf32>
    %49 = tpu.concatenate %8, %48, %47 in 1 : vector<16x32xf32>, vector<16x32xf32>, vector<16x32xf32> -> vector<16x96xf32>
    %c0_32 = arith.constant 0 : index
    %c0_33 = arith.constant 0 : index
    %c0_34 = arith.constant 0 : index
    %50 = vector.load %arg9[%c0_32, %c0_33, %c0_34] : memref<2x96x32xf32, #tpu.memory_space<vmem>>, vector<1x96x32xf32>
    %51 = vector.shape_cast %50 : vector<1x96x32xf32> to vector<96x32xf32>
    %cst_35 = arith.constant dense<0.000000e+00> : vector<16x32xf32>
    %52 = tpu.matmul %49, %51, %cst_35 {dimension_numbers = #tpu.dot_dimension_numbers<[1], [0], [0], [1], [0, 0, 1, 1], [], []>} : vector<16x96xf32>, vector<96x32xf32>, vector<16x32xf32> -> vector<16x32xf32>
    %c0_36 = arith.constant 0 : index
    %c0_37 = arith.constant 0 : index
    %c0_38 = arith.constant 0 : index
    %53 = vector.load %arg10[%c0_36, %c0_37, %c0_38] : memref<2x1x32xf32, #tpu.memory_space<vmem>>, vector<1x1x32xf32>
    %54 = vector.shape_cast %53 : vector<1x1x32xf32> to vector<1x32xf32>
    %55 = vector.broadcast %54 : vector<1x32xf32> to vector<16x32xf32>
    %56 = arith.addf %52, %55 : vector<16x32xf32>
    %cst_39 = arith.constant 0.000000e+00 : f32
    %57 = vector.broadcast %cst_39 : f32 to vector<16x32xf32>
    %58 = arith.cmpf ogt, %56, %57 : vector<16x32xf32>
    %cst_40 = arith.constant 0.00999999977 : f32
    %59 = vector.broadcast %cst_40 : f32 to vector<16x32xf32>
    %60 = arith.mulf %59, %56 : vector<16x32xf32>
    %61 = arith.select %58, %56, %60 : vector<16x32xi1>, vector<16x32xf32>
    %62 = arith.addf %61, %8 : vector<16x32xf32>
    %c0_41 = arith.constant 0 : index
    %c0_42 = arith.constant 0 : index
    %c0_43 = arith.constant 0 : index
    %63 = vector.load %arg11[%c0_41, %c0_42, %c0_43] : memref<2x32x33xf32, #tpu.memory_space<vmem>>, vector<1x32x33xf32>
    %64 = vector.shape_cast %63 : vector<1x32x33xf32> to vector<32x33xf32>
    %cst_44 = arith.constant dense<0.000000e+00> : vector<16x33xf32>
    %65 = tpu.matmul %62, %64, %cst_44 {dimension_numbers = #tpu.dot_dimension_numbers<[1], [0], [0], [1], [0, 0, 1, 1], [], []>} : vector<16x32xf32>, vector<32x33xf32>, vector<16x33xf32> -> vector<16x33xf32>
    %66 = vector.extract_strided_slice %65 {offsets = [0, 0], sizes = [16, 32], strides = [1, 1]} : vector<16x33xf32> to vector<16x32xf32>
    %c0_45 = arith.constant 0 : index
    %c0_46 = arith.constant 0 : index
    %c0_47 = arith.constant 0 : index
    %67 = vector.load %arg12[%c0_45, %c0_46, %c0_47] : memref<2x1x32xf32, #tpu.memory_space<vmem>>, vector<1x1x32xf32>
    %68 = vector.shape_cast %67 : vector<1x1x32xf32> to vector<1x32xf32>
    %69 = vector.broadcast %68 : vector<1x32xf32> to vector<16x32xf32>
    %70 = arith.addf %66, %69 : vector<16x32xf32>
    %cst_48 = arith.constant 0.000000e+00 : f32
    %71 = vector.broadcast %cst_48 : f32 to vector<16x32xf32>
    %72 = arith.cmpf ogt, %70, %71 : vector<16x32xf32>
    %cst_49 = arith.constant 0.00999999977 : f32
    %73 = vector.broadcast %cst_49 : f32 to vector<16x32xf32>
    %74 = arith.mulf %73, %70 : vector<16x32xf32>
    %75 = arith.select %72, %70, %74 : vector<16x32xi1>, vector<16x32xf32>
    %76 = vector.extract_strided_slice %65 {offsets = [0, 32], sizes = [16, 1], strides = [1, 1]} : vector<16x33xf32> to vector<16x1xf32>
    %c0_50 = arith.constant 0 : index
    %77 = memref.load %arg15[%c0_50] : memref<2xf32, #tpu.memory_space<smem>>
    %78 = vector.broadcast %77 : f32 to vector<16x1xf32>
    %79 = arith.addf %76, %78 : vector<16x1xf32>
    %80 = vector.shape_cast %4 : vector<2x16xf32> to vector<2x16x1xf32>
    %81 = vector.shape_cast %79 : vector<16x1xf32> to vector<1x16x1xf32>
    %82 = vector.broadcast %81 : vector<1x16x1xf32> to vector<2x16x1xf32>
    %83 = arith.addf %80, %82 : vector<2x16x1xf32>
    %cst_51 = arith.constant dense<0xFF800000> : vector<2x1xf32>
    %84 = vector.multi_reduction <maximumf>, %83, %cst_51 [1] : vector<2x16x1xf32> to vector<2x1xf32>
    %cst_52 = arith.constant dense<0.000000e+00> : vector<16x1xf32>
    %85 = tpu.matmul %5, %84, %cst_52 {dimension_numbers = #tpu.dot_dimension_numbers<[1], [0], [0], [1], [0, 0, 1, 1], [], []>} : vector<16x2xf32>, vector<2x1xf32>, vector<16x1xf32> -> vector<16x1xf32>
    %86 = arith.subf %79, %85 : vector<16x1xf32>
    %87 = math.exp %86 : vector<16x1xf32>
    %88 = vector.broadcast %87 : vector<16x1xf32> to vector<16x32xf32>
    %89 = arith.mulf %88, %75 : vector<16x32xf32>
    %90 = tpu.concatenate %89, %87 in 1 : vector<16x32xf32>, vector<16x1xf32> -> vector<16x33xf32>
    %cst_53 = arith.constant dense<0.000000e+00> : vector<2x33xf32>
    %91 = tpu.matmul %0, %90, %cst_53 {dimension_numbers = #tpu.dot_dimension_numbers<[1], [0], [0], [1], [0, 0, 1, 1], [], []>} : vector<2x16xf32>, vector<16x33xf32>, vector<2x33xf32> -> vector<2x33xf32>
    %92 = vector.extract_strided_slice %91 {offsets = [0, 0], sizes = [2, 32], strides = [1, 1]} : vector<2x33xf32> to vector<2x32xf32>
    %93 = vector.extract_strided_slice %91 {offsets = [0, 32], sizes = [2, 1], strides = [1, 1]} : vector<2x33xf32> to vector<2x1xf32>
    %94 = vector.broadcast %93 : vector<2x1xf32> to vector<2x32xf32>
    %95 = arith.divf %92, %94 : vector<2x32xf32>
    %96 = tpu.concatenate %95, %9 in 1 : vector<2x32xf32>, vector<2x32xf32> -> vector<2x64xf32>
    %c0_54 = arith.constant 0 : index
    %c0_55 = arith.constant 0 : index
    %c0_56 = arith.constant 0 : index
    %97 = vector.load %arg13[%c0_54, %c0_55, %c0_56] : memref<2x64x32xf32, #tpu.memory_space<vmem>>, vector<1x64x32xf32>
    %98 = vector.shape_cast %97 : vector<1x64x32xf32> to vector<64x32xf32>
    %cst_57 = arith.constant dense<0.000000e+00> : vector<2x32xf32>
    %99 = tpu.matmul %96, %98, %cst_57 {dimension_numbers = #tpu.dot_dimension_numbers<[1], [0], [0], [1], [0, 0, 1, 1], [], []>} : vector<2x64xf32>, vector<64x32xf32>, vector<2x32xf32> -> vector<2x32xf32>
    %c0_58 = arith.constant 0 : index
    %c0_59 = arith.constant 0 : index
    %c0_60 = arith.constant 0 : index
    %100 = vector.load %arg14[%c0_58, %c0_59, %c0_60] : memref<2x1x32xf32, #tpu.memory_space<vmem>>, vector<1x1x32xf32>
    %101 = vector.shape_cast %100 : vector<1x1x32xf32> to vector<1x32xf32>
    %102 = vector.broadcast %101 : vector<1x32xf32> to vector<2x32xf32>
    %103 = arith.addf %99, %102 : vector<2x32xf32>
    %cst_61 = arith.constant 0.000000e+00 : f32
    %104 = vector.broadcast %cst_61 : f32 to vector<2x32xf32>
    %105 = arith.cmpf ogt, %103, %104 : vector<2x32xf32>
    %cst_62 = arith.constant 0.00999999977 : f32
    %106 = vector.broadcast %cst_62 : f32 to vector<2x32xf32>
    %107 = arith.mulf %106, %103 : vector<2x32xf32>
    %108 = arith.select %105, %103, %107 : vector<2x32xi1>, vector<2x32xf32>
    %109 = arith.addf %108, %9 : vector<2x32xf32>
    %c1 = arith.constant 1 : index
    %c0_63 = arith.constant 0 : index
    %c0_64 = arith.constant 0 : index
    %110 = vector.load %arg7[%c1, %c0_63, %c0_64] : memref<2x32x32xf32, #tpu.memory_space<vmem>>, vector<1x32x32xf32>
    %111 = vector.shape_cast %110 : vector<1x32x32xf32> to vector<32x32xf32>
    %cst_65 = arith.constant dense<0.000000e+00> : vector<16x32xf32>
    %112 = tpu.matmul %62, %111, %cst_65 {dimension_numbers = #tpu.dot_dimension_numbers<[1], [0], [0], [1], [0, 0, 1, 1], [], []>} : vector<16x32xf32>, vector<32x32xf32>, vector<16x32xf32> -> vector<16x32xf32>
    %c1_66 = arith.constant 1 : index
    %c0_67 = arith.constant 0 : index
    %c0_68 = arith.constant 0 : index
    %113 = vector.load %arg8[%c1_66, %c0_67, %c0_68] : memref<2x1x32xf32, #tpu.memory_space<vmem>>, vector<1x1x32xf32>
    %114 = vector.shape_cast %113 : vector<1x1x32xf32> to vector<1x32xf32>
    %115 = vector.broadcast %114 : vector<1x32xf32> to vector<16x32xf32>
    %116 = arith.addf %112, %115 : vector<16x32xf32>
    %cst_69 = arith.constant dense<0.000000e+00> : vector<32x128xf32>
    %117 = tpu.matmul %116, %7, %cst_69 {dimension_numbers = #tpu.dot_dimension_numbers<[0], [0], [1], [1], [0, 1, 1, 1], [], []>} : vector<16x32xf32>, vector<16x128xf32>, vector<32x128xf32> -> vector<32x128xf32>
    %cst_70 = arith.constant 0.000000e+00 : f32
    %118 = vector.broadcast %cst_70 : f32 to vector<32x128xf32>
    %119 = arith.cmpf ogt, %117, %118 : vector<32x128xf32>
    %cst_71 = arith.constant 0.00999999977 : f32
    %120 = vector.broadcast %cst_71 : f32 to vector<32x128xf32>
    %121 = arith.mulf %120, %117 : vector<32x128xf32>
    %122 = arith.select %119, %117, %121 : vector<32x128xi1>, vector<32x128xf32>
    %cst_72 = arith.constant -1.000000e+30 : f32
    %123 = vector.broadcast %cst_72 : f32 to vector<8x32xf32>
    %c0_73 = arith.constant 0 : index
    %c0_74 = arith.constant 0 : index
    %124 = vector.load %arg3[%c0_73, %c0_74] : memref<16x128xf32, #tpu.memory_space<vmem>>, vector<8x128xf32>
    %125 = vector.shape_cast %124 : vector<8x128xf32> to vector<8x1x128xf32>
    %126 = vector.shape_cast %122 : vector<32x128xf32> to vector<1x32x128xf32>
    %127 = vector.broadcast %125 : vector<8x1x128xf32> to vector<8x32x128xf32>
    %128 = vector.broadcast %126 : vector<1x32x128xf32> to vector<8x32x128xf32>
    %129 = arith.addf %127, %128 : vector<8x32x128xf32>
    %cst_75 = arith.constant dense<0xFF800000> : vector<8x32xf32>
    %130 = vector.multi_reduction <maximumf>, %129, %cst_75 [2] : vector<8x32x128xf32> to vector<8x32xf32>
    %131 = arith.maximumf %123, %130 : vector<8x32xf32>
    %cst_76 = arith.constant -1.000000e+30 : f32
    %132 = vector.broadcast %cst_76 : f32 to vector<8x32xf32>
    %c8_77 = arith.constant 8 : index
    %c0_78 = arith.constant 0 : index
    %133 = vector.load %arg3[%c8_77, %c0_78] : memref<16x128xf32, #tpu.memory_space<vmem>>, vector<8x128xf32>
    %134 = vector.shape_cast %133 : vector<8x128xf32> to vector<8x1x128xf32>
    %135 = vector.shape_cast %122 : vector<32x128xf32> to vector<1x32x128xf32>
    %136 = vector.broadcast %134 : vector<8x1x128xf32> to vector<8x32x128xf32>
    %137 = vector.broadcast %135 : vector<1x32x128xf32> to vector<8x32x128xf32>
    %138 = arith.addf %136, %137 : vector<8x32x128xf32>
    %cst_79 = arith.constant dense<0xFF800000> : vector<8x32xf32>
    %139 = vector.multi_reduction <maximumf>, %138, %cst_79 [2] : vector<8x32x128xf32> to vector<8x32xf32>
    %140 = arith.maximumf %132, %139 : vector<8x32xf32>
    %141 = tpu.concatenate %131, %140 in 0 : vector<8x32xf32>, vector<8x32xf32> -> vector<16x32xf32>
    %cst_80 = arith.constant 5.000000e-01 : f32
    %142 = vector.broadcast %cst_80 : f32 to vector<16x1xf32>
    %143 = arith.cmpf ogt, %6, %142 : vector<16x1xf32>
    %cst_81 = arith.constant 0.000000e+00 : f32
    %144 = vector.shape_cast %143 : vector<16x1xi1> to vector<16x1xi1>
    %145 = vector.broadcast %144 : vector<16x1xi1> to vector<16x32xi1>
    %146 = vector.broadcast %cst_81 : f32 to vector<16x32xf32>
    %147 = arith.select %145, %141, %146 : vector<16x32xi1>, vector<16x32xf32>
    %cst_82 = arith.constant dense<0.000000e+00> : vector<16x32xf32>
    %148 = tpu.matmul %5, %109, %cst_82 {dimension_numbers = #tpu.dot_dimension_numbers<[1], [0], [0], [1], [0, 0, 1, 1], [], []>} : vector<16x2xf32>, vector<2x32xf32>, vector<16x32xf32> -> vector<16x32xf32>
    %149 = tpu.concatenate %62, %148, %147 in 1 : vector<16x32xf32>, vector<16x32xf32>, vector<16x32xf32> -> vector<16x96xf32>
    %c1_83 = arith.constant 1 : index
    %c0_84 = arith.constant 0 : index
    %c0_85 = arith.constant 0 : index
    %150 = vector.load %arg9[%c1_83, %c0_84, %c0_85] : memref<2x96x32xf32, #tpu.memory_space<vmem>>, vector<1x96x32xf32>
    %151 = vector.shape_cast %150 : vector<1x96x32xf32> to vector<96x32xf32>
    %cst_86 = arith.constant dense<0.000000e+00> : vector<16x32xf32>
    %152 = tpu.matmul %149, %151, %cst_86 {dimension_numbers = #tpu.dot_dimension_numbers<[1], [0], [0], [1], [0, 0, 1, 1], [], []>} : vector<16x96xf32>, vector<96x32xf32>, vector<16x32xf32> -> vector<16x32xf32>
    %c1_87 = arith.constant 1 : index
    %c0_88 = arith.constant 0 : index
    %c0_89 = arith.constant 0 : index
    %153 = vector.load %arg10[%c1_87, %c0_88, %c0_89] : memref<2x1x32xf32, #tpu.memory_space<vmem>>, vector<1x1x32xf32>
    %154 = vector.shape_cast %153 : vector<1x1x32xf32> to vector<1x32xf32>
    %155 = vector.broadcast %154 : vector<1x32xf32> to vector<16x32xf32>
    %156 = arith.addf %152, %155 : vector<16x32xf32>
    %cst_90 = arith.constant 0.000000e+00 : f32
    %157 = vector.broadcast %cst_90 : f32 to vector<16x32xf32>
    %158 = arith.cmpf ogt, %156, %157 : vector<16x32xf32>
    %cst_91 = arith.constant 0.00999999977 : f32
    %159 = vector.broadcast %cst_91 : f32 to vector<16x32xf32>
    %160 = arith.mulf %159, %156 : vector<16x32xf32>
    %161 = arith.select %158, %156, %160 : vector<16x32xi1>, vector<16x32xf32>
    %162 = arith.addf %161, %62 : vector<16x32xf32>
    %c1_92 = arith.constant 1 : index
    %c0_93 = arith.constant 0 : index
    %c0_94 = arith.constant 0 : index
    %163 = vector.load %arg11[%c1_92, %c0_93, %c0_94] : memref<2x32x33xf32, #tpu.memory_space<vmem>>, vector<1x32x33xf32>
    %164 = vector.shape_cast %163 : vector<1x32x33xf32> to vector<32x33xf32>
    %cst_95 = arith.constant dense<0.000000e+00> : vector<16x33xf32>
    %165 = tpu.matmul %162, %164, %cst_95 {dimension_numbers = #tpu.dot_dimension_numbers<[1], [0], [0], [1], [0, 0, 1, 1], [], []>} : vector<16x32xf32>, vector<32x33xf32>, vector<16x33xf32> -> vector<16x33xf32>
    %166 = vector.extract_strided_slice %165 {offsets = [0, 0], sizes = [16, 32], strides = [1, 1]} : vector<16x33xf32> to vector<16x32xf32>
    %c1_96 = arith.constant 1 : index
    %c0_97 = arith.constant 0 : index
    %c0_98 = arith.constant 0 : index
    %167 = vector.load %arg12[%c1_96, %c0_97, %c0_98] : memref<2x1x32xf32, #tpu.memory_space<vmem>>, vector<1x1x32xf32>
    %168 = vector.shape_cast %167 : vector<1x1x32xf32> to vector<1x32xf32>
    %169 = vector.broadcast %168 : vector<1x32xf32> to vector<16x32xf32>
    %170 = arith.addf %166, %169 : vector<16x32xf32>
    %cst_99 = arith.constant 0.000000e+00 : f32
    %171 = vector.broadcast %cst_99 : f32 to vector<16x32xf32>
    %172 = arith.cmpf ogt, %170, %171 : vector<16x32xf32>
    %cst_100 = arith.constant 0.00999999977 : f32
    %173 = vector.broadcast %cst_100 : f32 to vector<16x32xf32>
    %174 = arith.mulf %173, %170 : vector<16x32xf32>
    %175 = arith.select %172, %170, %174 : vector<16x32xi1>, vector<16x32xf32>
    %176 = vector.extract_strided_slice %165 {offsets = [0, 32], sizes = [16, 1], strides = [1, 1]} : vector<16x33xf32> to vector<16x1xf32>
    %c1_101 = arith.constant 1 : index
    %177 = memref.load %arg15[%c1_101] : memref<2xf32, #tpu.memory_space<smem>>
    %178 = vector.broadcast %177 : f32 to vector<16x1xf32>
    %179 = arith.addf %176, %178 : vector<16x1xf32>
    %180 = vector.shape_cast %4 : vector<2x16xf32> to vector<2x16x1xf32>
    %181 = vector.shape_cast %179 : vector<16x1xf32> to vector<1x16x1xf32>
    %182 = vector.broadcast %181 : vector<1x16x1xf32> to vector<2x16x1xf32>
    %183 = arith.addf %180, %182 : vector<2x16x1xf32>
    %cst_102 = arith.constant dense<0xFF800000> : vector<2x1xf32>
    %184 = vector.multi_reduction <maximumf>, %183, %cst_102 [1] : vector<2x16x1xf32> to vector<2x1xf32>
    %cst_103 = arith.constant dense<0.000000e+00> : vector<16x1xf32>
    %185 = tpu.matmul %5, %184, %cst_103 {dimension_numbers = #tpu.dot_dimension_numbers<[1], [0], [0], [1], [0, 0, 1, 1], [], []>} : vector<16x2xf32>, vector<2x1xf32>, vector<16x1xf32> -> vector<16x1xf32>
    %186 = arith.subf %179, %185 : vector<16x1xf32>
    %187 = math.exp %186 : vector<16x1xf32>
    %188 = vector.broadcast %187 : vector<16x1xf32> to vector<16x32xf32>
    %189 = arith.mulf %188, %175 : vector<16x32xf32>
    %190 = tpu.concatenate %189, %187 in 1 : vector<16x32xf32>, vector<16x1xf32> -> vector<16x33xf32>
    %cst_104 = arith.constant dense<0.000000e+00> : vector<2x33xf32>
    %191 = tpu.matmul %0, %190, %cst_104 {dimension_numbers = #tpu.dot_dimension_numbers<[1], [0], [0], [1], [0, 0, 1, 1], [], []>} : vector<2x16xf32>, vector<16x33xf32>, vector<2x33xf32> -> vector<2x33xf32>
    %192 = vector.extract_strided_slice %191 {offsets = [0, 0], sizes = [2, 32], strides = [1, 1]} : vector<2x33xf32> to vector<2x32xf32>
    %193 = vector.extract_strided_slice %191 {offsets = [0, 32], sizes = [2, 1], strides = [1, 1]} : vector<2x33xf32> to vector<2x1xf32>
    %194 = vector.broadcast %193 : vector<2x1xf32> to vector<2x32xf32>
    %195 = arith.divf %192, %194 : vector<2x32xf32>
    %196 = tpu.concatenate %195, %109 in 1 : vector<2x32xf32>, vector<2x32xf32> -> vector<2x64xf32>
    %c1_105 = arith.constant 1 : index
    %c0_106 = arith.constant 0 : index
    %c0_107 = arith.constant 0 : index
    %197 = vector.load %arg13[%c1_105, %c0_106, %c0_107] : memref<2x64x32xf32, #tpu.memory_space<vmem>>, vector<1x64x32xf32>
    %198 = vector.shape_cast %197 : vector<1x64x32xf32> to vector<64x32xf32>
    %cst_108 = arith.constant dense<0.000000e+00> : vector<2x32xf32>
    %199 = tpu.matmul %196, %198, %cst_108 {dimension_numbers = #tpu.dot_dimension_numbers<[1], [0], [0], [1], [0, 0, 1, 1], [], []>} : vector<2x64xf32>, vector<64x32xf32>, vector<2x32xf32> -> vector<2x32xf32>
    %c1_109 = arith.constant 1 : index
    %c0_110 = arith.constant 0 : index
    %c0_111 = arith.constant 0 : index
    %200 = vector.load %arg14[%c1_109, %c0_110, %c0_111] : memref<2x1x32xf32, #tpu.memory_space<vmem>>, vector<1x1x32xf32>
    %201 = vector.shape_cast %200 : vector<1x1x32xf32> to vector<1x32xf32>
    %202 = vector.broadcast %201 : vector<1x32xf32> to vector<2x32xf32>
    %203 = arith.addf %199, %202 : vector<2x32xf32>
    %cst_112 = arith.constant 0.000000e+00 : f32
    %204 = vector.broadcast %cst_112 : f32 to vector<2x32xf32>
    %205 = arith.cmpf ogt, %203, %204 : vector<2x32xf32>
    %cst_113 = arith.constant 0.00999999977 : f32
    %206 = vector.broadcast %cst_113 : f32 to vector<2x32xf32>
    %207 = arith.mulf %206, %203 : vector<2x32xf32>
    %208 = arith.select %205, %203, %207 : vector<2x32xi1>, vector<2x32xf32>
    %209 = arith.addf %208, %109 : vector<2x32xf32>
    %c0_114 = arith.constant 0 : index
    %c0_115 = arith.constant 0 : index
    %210 = vector.load %arg16[%c0_114, %c0_115] : memref<16x32xf32, #tpu.memory_space<vmem>>, vector<16x32xf32>
    tpu.vector_store %arg16[%c0_114, %c0_115], %162 {strides = array<i32>} : memref<16x32xf32, #tpu.memory_space<vmem>>, vector<16x32xf32>,
    %c0_116 = arith.constant 0 : index
    %c0_117 = arith.constant 0 : index
    %211 = vector.load %arg17[%c0_116, %c0_117] : memref<2x32xf32, #tpu.memory_space<vmem>>, vector<2x32xf32>
    tpu.vector_store %arg17[%c0_116, %c0_117], %209 {strides = array<i32>} : memref<2x32xf32, #tpu.memory_space<vmem>>, vector<2x32xf32>,
    return
  }
}

</mosaic_0001>

<bundles_post_ra>
// kernel: tpu_custom_call.1
= control target key start
LH: loop header
LB: loop body
LE: loop exit
PB: predicated region body
PF: predicated region fallthrough
CT: control target
= control target key end

     0   :  { %s3505_s0 = inlined_call_operand.vmem [shape: f32[16,32], index: 0, kind: input, shape index: {}]   ;;  %s3506_s1 = inlined_call_operand.vmem [shape: f32[2,32], index: 1, kind: input, shape index: {}]   ;;  %s3507_s2 = inlined_call_operand.vmem [shape: f32[16,128], index: 2, kind: input, shape index: {}]   ;;  %s3508_s3 = inlined_call_operand.vmem [shape: f32[16,128], index: 3, kind: input, shape index: {}]   ;;  %s3509_s4 = inlined_call_operand.vmem [shape: f32[2,16], index: 4, kind: input, shape index: {}]   ;;  %s3510_s5 = inlined_call_operand.vmem [shape: f32[16,2], index: 5, kind: input, shape index: {}]   ;;  %s3511_s6 = inlined_call_operand.vmem [shape: f32[16,1], index: 6, kind: input, shape index: {}]   ;;  %s3512_s7 = inlined_call_operand.vmem [shape: f32[2,32,32], index: 7, kind: input, shape index: {}]   ;;  %s3513_s8 = inlined_call_operand.vmem [shape: f32[2,1,32], index: 8, kind: input, shape index: {}]   ;;  %s3514_s9 = inlined_call_operand.vmem [shape: f32[2,96,32], index: 9, kind: input, shape index: {}]   ;;  %s3515_s10 = inlined_call_operand.vmem [shape: f32[2,1,32], index: 10, kind: input, shape index: {}]   ;;  %s3516_s11 = inlined_call_operand.vmem [shape: f32[2,32,33], index: 11, kind: input, shape index: {}]   ;;  %s3517_s12 = inlined_call_operand.vmem [shape: f32[2,1,32], index: 12, kind: input, shape index: {}]   ;;  %s3518_s13 = inlined_call_operand.vmem [shape: f32[2,64,32], index: 13, kind: input, shape index: {}]   ;;  %s3519_s14 = inlined_call_operand.vmem [shape: f32[2,1,32], index: 14, kind: input, shape index: {}]   ;;  %s3520_s15 = inlined_call_operand.vmem [shape: f32[2], index: 15, kind: input, shape index: {}]   ;;  %s3521_s16 = inlined_call_operand.hbm [shape: f32[16,32], index: 16, kind: output, shape index: {0}]   ;;  %s3522_s17 = inlined_call_operand.hbm [shape: f32[2,32], index: 17, kind: output, shape index: {1}]  }
   0x1   :  { %3566 = sst [smem:[#allocation28_spill]] %s3505_s0 }
   0x2   :  { %3567 = sst [smem:[#allocation29_spill]] %s3506_s1 }
   0x3   :  { %23 = vsyncpa [#allocation4], 0 }
   0x4   :  { %24 = vsyncpa [#allocation3], 0 }
   0x5   :  { %25 = vsyncpa [#allocation7], 0  ;;  %s61_s26 = sshll.u32 %s3520_s15, 4  ;;  %s2192_s27 = smov [#allocation2]   ;;  %s62_s26 = int_to_ptr.vmem [resolvable:$true] %s61_s26 }
   0x6   :  { %64 = dma.vmem_to_smem %s62_s26, 16, %s2192_s27, [#allocation4]  }
   0x7   :  { %2186 = dma.done.wait [#allocation4], 16  }
   0x8   :  { %2187 = vsyncadd [#allocation4], 4294967280 }
   0x9   :  { %69 = sfence }
   0xa   :  { %v85_v0 = vld [vmem:[%s3512_s7 + $0x18] sm:$0xff]  ;;  %v84_v1 = vld [vmem:[%s3512_s7 + $0x10] sm:$0xff]  ;;  %v83_v2 = vld [vmem:[%s3512_s7 + $0x8] sm:$0xff]  ;;  %s3568_s22 = sld [smem:[#allocation28_spill]]  ;;  %vm90_vm0 = vcmask 261120   ;;  %v2193_v14 = vmov 0  }
   0xb   :  { %109 = vmatpush.msra.mxu0 %v85_v0  ;;  %v82_v3 = vld [vmem:[%s3512_s7] sm:$0xff]  ;;  %v78_v6 = vld [vmem:[%s3507_s2 + $0x8] sm:$0xff]  ;;  %2089 = vset.pattern.permute.xlu1 %v2193_v14  ;;  %vm152_vm2 = vcmask 130048   ;;  %s3585_s23 = sld [smem:[#allocation29_spill]]  ;;  %vm740_vm7 = vcmask 1041408   ;;  %vm733_vm8 = vcmask 15360  }
   0xc   :  { %179 = vmatpush.msra.mxu1 %v78_v6  ;;  %v2098_v7 = vld [vmem:[%s3513_s8] ss:$0 sm:$0xff]  ;;  %v2337_v20 = vld [vmem:[%s3508_s3 + $0x8] sm:$0xff]  ;;  %vm549_vm10 = vcmask 130112   ;;  %vm553_vm11 = vcmask 195712   ;;  %vm557_vm12 = vcmask 261312  }
   0xd   :  { %110 = vmatpush.msra.mxu0 %v84_v1  ;;  %v77_v12 = vld [vmem:[%s3507_s2] sm:$0xff]  ;;  %v365_v22 = vrot.slane %v2337_v20, 5  ;;  %v362_v35 = vrot.slane %v2337_v20, 2  ;;  %v364_v44 = vrot.slane %v2337_v20, 4  ;;  %v2381_v47 = vperm.slane %v2337_v20, 0  ;;  %s2195_s0 = smov 64  }
   0xe   :  { %180 = vmatpush.msra.mxu1 %v77_v12  ;;  %v75_v13 = vld [vmem:[%s3511_s6] sm:$0xff]  ;;  %v361_v52 = vrot.slane %v2337_v20, 1  ;;  %v367_v53 = vrot.slane %v2337_v20, 7  ;;  %vm608_vm13 = vcmask 1041409   ;;  %vm610_vm15 = vcmask 1042434   ;;  %s887_s30 = sld [smem:[#allocation2]] }
   0xf   :  { %111 = vmatpush.msra.mxu0 %v83_v2  ;;  %vm719_vm1 = vcmp.gt.f32.partialorder %v75_v13, 0.5  ;;  %v2342_v21 = vld [vmem:[%s3508_s3] sm:$0xff]  ;;  %v2346_v25 = vperm.slane %v365_v22, 0  ;;  %v2368_v40 = vperm.slane %v362_v35, 0  ;;  %3575 = vst [vmem:[#allocation17_spill] sm:$0xff] %v2381_v47  ;;  %v2383_v48 = vperm.slane %v364_v44, 0 }
  0x10   :  { %v79_v4 = vld [vmem:[%s3568_s22] sm:$0xff]  ;;  %v80_v5 = vld [vmem:[%s3568_s22 + $0x8] sm:$0xff]  ;;  %v721_v15 = vsel %vm719_vm1, 1, %v2193_v14  ;;  %v208_v23 = vrot.slane %v2342_v21, 1  ;;  %v2351_v27 = vperm.slane %v2342_v21, 0  ;;  %v209_v33 = vrot.slane %v2342_v21, 2 }
  0x11   :  { %112 = vmatpush.msra.mxu0 %v82_v3  ;;  %724 = vperm.xlu1 %2089, %v721_v15   ;;  %3569 = vst [vmem:[#allocation11_spill] sm:$0xff] %v2346_v25  ;;  %v210_v34 = vrot.slane %v2342_v21, 3  ;;  %v211_v46 = vrot.slane %v2342_v21, 4  ;;  %v212_v55 = vrot.slane %v2342_v21, 5  ;;  %v2396_v56 = vperm.slane %v361_v52, 0  ;;  %s2196_s18 = smov 96  }
  0x12   :  { %2009 = vmatmul.msk.f32.vlgmr.msra.gmra.mxu0 %vm90_vm0, %v79_v4  ;;  %v2348_v26 = vperm.slane %v208_v23, 0  ;;  %3571 = vst [vmem:[#allocation13_spill] sm:$0xff] %v2351_v27  ;;  %v2364_v37 = vperm.slane %v209_v33, 0  ;;  %v2398_v57 = vperm.slane %v367_v53, 0  ;;  %v213_v0 = vrot.slane %v2342_v21, 6  ;;  %s2199_s26 = smov 128  }
  0x13   :  { %v2366_v39 = vperm.slane %v210_v34, 0  ;;  %3574 = vst [vmem:[#allocation16_spill] sm:$0xff] %v2368_v40  ;;  %v2385_v49 = vperm.slane %v211_v46, 0  ;;  %v2400_v59 = vperm.slane %v212_v55, 0  ;;  %v214_v6 = vrot.slane %v2342_v21, 7  ;;  %s2200_s27 = smov 8  }
  0x14   :  { %3570 = vst [vmem:[#allocation12_spill] sm:$0xff] %v2348_v26  ;;  %v2411_v2 = vperm.slane %v213_v0, 0  ;;  %vm612_vm1 = vcmask 1043459  }
  0x15   :  { %3572 = vst [vmem:[#allocation14_spill] sm:$0xff] %v2364_v37 }
  0x16   :  { %3573 = vst [vmem:[#allocation15_spill] sm:$0xff] %v2366_v39 }
  0x17   :  { %3576 = vst [vmem:[#allocation18_spill] sm:$0xff] %v2383_v48 }
  0x18   :  { %3577 = vst [vmem:[#allocation19_spill] sm:$0xff] %v2385_v49 }
  0x19   :  { %3578 = vst [vmem:[#allocation20_spill] sm:$0xff] %v2396_v56 }
  0x1a   :  { %2010 = vmatmul.msk.f32.gmra.mxu0 %vm90_vm0, %v80_v5  ;;  %3579 = vst [vmem:[#allocation21_spill] sm:$0xff] %v2398_v57 }
  0x1b   :  { %3580 = vst [vmem:[#allocation22_spill] sm:$0xff] %v2400_v59 }
  0x1c   :  { %3581 = vst [vmem:[#allocation23_spill] sm:$0xff] %v2411_v2 }
  0x83   :  { %v2476_v46 = vpop.permute.xlu1 %724 }
  0x84   :  { %vm3560_vm14 = vcmp.eq.s32.totalorder %v2476_v46, 1 }
  0x8f   :  { %v114_v8 = vpop.f32.mrf.mxu0 }
  0x90   :  { %v115_v9 = vadd.f32 %v2098_v7, %v114_v8 }
  0x92   :  { %120 = vxpose.xlu0.b32.start [1/2] (short) (narrow) %v115_v9, 32 }
  0x97   :  { %v117_v10 = vpop.f32.mrf.mxu0 }
  0x98   :  { %v118_v11 = vadd.f32 %v2098_v7, %v117_v10  ;;  %v2420_v7 = vperm.slane %v214_v6, 0 }
  0x9a   :  { %121 = vxpose.xlu0.b32.end [2/2] (short) (narrow) %v118_v11, 32  ;;  %3582 = vst [vmem:[#allocation24_spill] sm:$0xff] %v2420_v7  ;;  %v363_v11 = vrot.slane %v2337_v20, 3 }
  0x9c   :  { %v2429_v12 = vperm.slane %v363_v11, 0 }
  0x9e   :  { %3583 = vst [vmem:[#allocation25_spill] sm:$0xff] %v2429_v12 }
 0x101   :  { %2090 = vset.pattern.permute.xlu0 %v2193_v14 }
 0x136   :  { %v136_v16 = vpop.trf.xlu0 }
 0x137   :  { %2011 = vmatmul.msk.f32.vlgmr.msra.gmra.mxu1 %vm152_vm2, %v136_v16 }
 0x13e   :  { %v137_v17 = vpop.trf.xlu0 }
 0x13f   :  { %2012 = vmatmul.msk.f32.gmra.mxu1 %vm152_vm2, %v137_v17  ;;  %v366_v17 = vrot.slane %v2337_v20, 6 }
 0x146   :  { %v138_v18 = vpop.trf.xlu0 }
 0x147   :  { %2013 = vmatmul.msk.f32.gmra.mxu1 %vm152_vm2, %v138_v18 }
 0x14e   :  { %v139_v19 = vpop.trf.xlu0 }
 0x14f   :  { %2014 = vmatmul.msk.f32.gmra.mxu1 %vm152_vm2, %v139_v19  ;;  %v2438_v19 = vperm.slane %v366_v17, 0 }
 0x151   :  { %3584 = vst [vmem:[#allocation26_spill] sm:$0xff] %v2438_v19 }
 0x1b4   :  { %v182_v24 = vpop.f32.mrf.mxu1 }
 0x1b5   :  { %vm194_vm3 = vcmp.gt.f32.partialorder %v182_v24, 0.0  ;;  %v198_v28 = vmul.f32 0.01, %v182_v24 }
 0x1b7   :  { %v2353_v29 = vsel %vm194_vm3, %v182_v24, %v198_v28  ;;  %vm614_vm3 = vcmask 1044484  }
 0x1b8   :  { %v404_v30 = vadd.f32 %v2346_v25, %v2353_v29  ;;  %v235_v31 = vadd.f32 %v2348_v26, %v2353_v29  ;;  %v231_v32 = vadd.f32 %v2351_v27, %v2353_v29  ;;  %v239_v42 = vadd.f32 %v2364_v37, %v2353_v29 }
 0x1b9   :  { %v243_v45 = vadd.f32 %v2366_v39, %v2353_v29  ;;  %v384_v51 = vadd.f32 %v2381_v47, %v2353_v29  ;;  %v247_v54 = vadd.f32 %v2385_v49, %v2353_v29  ;;  %v388_v62 = vadd.f32 %v2396_v56, %v2353_v29 }
 0x1ba   :  { %456 = vmax.xlane.f32.xlu0 %v404_v30  ;;  %271 = vmax.xlane.f32.xlu2 %v235_v31  ;;  %v251_v63 = vadd.f32 %v2400_v59, %v2353_v29  ;;  %v392_v4 = vadd.f32 %v2368_v40, %v2353_v29  ;;  %v255_v5 = vadd.f32 %v2411_v2, %v2353_v29 }
 0x1bb   :  { %263 = vmax.xlane.f32.xlu1 %v231_v32  ;;  %v400_v9 = vadd.f32 %v2383_v48, %v2353_v29  ;;  %v259_v10 = vadd.f32 %v2420_v7, %v2353_v29  ;;  %v412_v15 = vadd.f32 %v2398_v57, %v2353_v29  ;;  %v396_v16 = vadd.f32 %v2429_v12, %v2353_v29 }
 0x1bc   :  { %v185_v36 = vpop.f32.mrf.mxu1  ;;  %v408_v24 = vadd.f32 %v2438_v19, %v2353_v29 }
 0x1bd   :  { %vm195_vm4 = vcmp.gt.f32.partialorder %v185_v36, 0.0  ;;  %v199_v38 = vmul.f32 0.01, %v185_v36 }
 0x1bf   :  { %v2370_v41 = vsel %vm195_vm4, %v185_v36, %v199_v38  ;;  %vm3565_vm4 = vcmask 1045509  }
 0x1c0   :  { %v393_v43 = vadd.f32 %v2368_v40, %v2370_v41  ;;  %v401_v50 = vadd.f32 %v2383_v48, %v2370_v41  ;;  %v413_v60 = vadd.f32 %v2398_v57, %v2370_v41  ;;  %v236_v23 = vadd.f32 %v2348_v26, %v2370_v41 }
 0x1c1   :  { %v244_v30 = vadd.f32 %v2366_v39, %v2370_v41  ;;  %v232_v31 = vadd.f32 %v2351_v27, %v2370_v41  ;;  %v248_v32 = vadd.f32 %v2385_v49, %v2370_v41  ;;  %v240_v33 = vadd.f32 %v2364_v37, %v2370_v41 }
 0x1c2   :  { %279 = vmax.xlane.f32.xlu2 %v239_v42  ;;  %434 = vmax.xlane.f32.xlu0 %v393_v43  ;;  %v252_v34 = vadd.f32 %v2400_v59, %v2370_v41  ;;  %v385_v35 = vadd.f32 %v2381_v47, %v2370_v41  ;;  %v256_v36 = vadd.f32 %v2411_v2, %v2370_v41 }
 0x1c3   :  { %287 = vmax.xlane.f32.xlu1 %v243_v45  ;;  %v389_v38 = vadd.f32 %v2396_v56, %v2370_v41  ;;  %v260_v42 = vadd.f32 %v2420_v7, %v2370_v41  ;;  %v405_v43 = vadd.f32 %v2346_v25, %v2370_v41  ;;  %v397_v45 = vadd.f32 %v2429_v12, %v2370_v41 }
 0x1c4   :  { %v188_v58 = vpop.f32.mrf.mxu1 }
 0x1c5   :  { %v200_v61 = vmul.f32 0.01, %v188_v58  ;;  %vm196_vm5 = vcmp.gt.f32.partialorder %v188_v58, 0.0 }
 0x1c7   :  { %v2409_v1 = vsel %vm196_vm5, %v188_v58, %v200_v61  ;;  %vm3564_vm5 = vcmask 1046534  }
 0x1c8   :  { %v233_v3 = vadd.f32 %v2351_v27, %v2409_v1  ;;  %v394_v8 = vadd.f32 %v2368_v40, %v2409_v1  ;;  %v406_v13 = vadd.f32 %v2346_v25, %v2409_v1  ;;  %v414_v21 = vadd.f32 %v2398_v57, %v2409_v1 }
 0x1c9   :  { %v237_v44 = vadd.f32 %v2348_v26, %v2409_v1  ;;  %v398_v55 = vadd.f32 %v2429_v12, %v2409_v1  ;;  %v410_v61 = vadd.f32 %v2438_v19, %v2409_v1  ;;  %v253_v6 = vadd.f32 %v2400_v59, %v2409_v1 }
 0x1ca   :  { %416 = vmax.xlane.f32.xlu2 %v384_v51  ;;  %450 = vmax.xlane.f32.xlu0 %v401_v50  ;;  %v409_v50 = vadd.f32 %v2438_v19, %v2370_v41  ;;  %v390_v51 = vadd.f32 %v2396_v56, %v2409_v1  ;;  %v257_v11 = vadd.f32 %v2411_v2, %v2409_v1 }
 0x1cb   :  { %295 = vmax.xlane.f32.xlu1 %v247_v54  ;;  %v241_v54 = vadd.f32 %v2364_v37, %v2409_v1 }
 0x1cc   :  { %v191_v18 = vpop.f32.mrf.mxu1 }
 0x1cd   :  { %v201_v22 = vmul.f32 0.01, %v191_v18  ;;  %vm197_vm6 = vcmp.gt.f32.partialorder %v191_v18, 0.0 }
 0x1cf   :  { %v2446_v20 = vsel %vm197_vm6, %v191_v18, %v201_v22  ;;  %vm3562_vm6 = vcmask 1047559  }
 0x1d0   :  { %v395_v28 = vadd.f32 %v2368_v40, %v2446_v20  ;;  %v407_v29 = vadd.f32 %v2346_v25, %v2446_v20  ;;  %v238_v0 = vadd.f32 %v2348_v26, %v2446_v20  ;;  %v250_v22 = vadd.f32 %v2385_v49, %v2446_v20 }
 0x1d2   :  { %424 = vmax.xlane.f32.xlu2 %v388_v62  ;;  %474 = vmax.xlane.f32.xlu0 %v413_v60  ;;  %v245_v60 = vadd.f32 %v2366_v39, %v2409_v1 }
 0x1d3   :  { %303 = vmax.xlane.f32.xlu1 %v251_v63 }
 0x1da   :  { %432 = vmax.xlane.f32.xlu2 %v392_v4  ;;  %267 = vmax.xlane.f32.xlu0 %v233_v3  ;;  %v249_v3 = vadd.f32 %v2385_v49, %v2409_v1 }
 0x1db   :  { %311 = vmax.xlane.f32.xlu1 %v255_v5 }
 0x1e2   :  { %448 = vmax.xlane.f32.xlu2 %v400_v9  ;;  %436 = vmax.xlane.f32.xlu0 %v394_v8  ;;  %v242_v8 = vadd.f32 %v2364_v37, %v2446_v20 }
 0x1e3   :  { %319 = vmax.xlane.f32.xlu1 %v259_v10 }
 0x1ea   :  { %472 = vmax.xlane.f32.xlu2 %v412_v15  ;;  %460 = vmax.xlane.f32.xlu0 %v406_v13  ;;  %v246_v13 = vadd.f32 %v2366_v39, %v2446_v20  ;;  %v2525_v15 = vld [vmem:[%s3585_s23] sm:$0x3] }
 0x1eb   :  { %440 = vmax.xlane.f32.xlu1 %v396_v16  ;;  %3586 = vst [vmem:[#allocation27_spill] sm:$0xff] %v2525_v15  ;;  %2015 = vmatpush.msk.msra.mxu2 %vm740_vm7, %v2525_v15  ;;  %v2532_v16 = vld [vmem:[%s3510_s5] sm:$0xff] }
 0x1ec   :  { %2016 = vmatmul.msk.f32.vlgmr.msra.gmra.mxu2 %vm733_vm8, %v2532_v16 }
 0x1f2   :  { %273 = vmax.xlane.f32.xlu2 %v236_v23  ;;  %476 = vmax.xlane.f32.xlu0 %v414_v21  ;;  %v261_v21 = vadd.f32 %v2420_v7, %v2409_v1  ;;  %v2547_v23 = vld [vmem:[%s3510_s5 + $0x8] sm:$0xff] }
 0x1f3   :  { %464 = vmax.xlane.f32.xlu1 %v408_v24 }
 0x1f4   :  { %2017 = vmatmul.msk.f32.gmra.mxu2 %vm733_vm8, %v2547_v23 }
 0x1fa   :  { %289 = vmax.xlane.f32.xlu2 %v244_v30  ;;  %438 = vmax.xlane.f32.xlu0 %v395_v28  ;;  %v386_v30 = vadd.f32 %v2381_v47, %v2409_v1 }
 0x1fb   :  { %265 = vmax.xlane.f32.xlu1 %v232_v31  ;;  %v254_v31 = vadd.f32 %v2400_v59, %v2446_v20 }
 0x202   :  { %297 = vmax.xlane.f32.xlu2 %v248_v32  ;;  %462 = vmax.xlane.f32.xlu0 %v407_v29 }
 0x203   :  { %281 = vmax.xlane.f32.xlu1 %v240_v33  ;;  %v402_v33 = vadd.f32 %v2383_v48, %v2409_v1 }
 0x20a   :  { %305 = vmax.xlane.f32.xlu2 %v252_v34  ;;  %v258_v34 = vadd.f32 %v2411_v2, %v2446_v20 }
 0x20b   :  { %418 = vmax.xlane.f32.xlu1 %v385_v35 }
 0x212   :  { %313 = vmax.xlane.f32.xlu2 %v256_v36 }
 0x213   :  { %426 = vmax.xlane.f32.xlu1 %v389_v38  ;;  %v234_v38 = vadd.f32 %v2351_v27, %v2446_v20 }
 0x21a   :  { %321 = vmax.xlane.f32.xlu2 %v260_v42  ;;  %v262_v42 = vadd.f32 %v2420_v7, %v2446_v20 }
 0x21b   :  { %458 = vmax.xlane.f32.xlu1 %v405_v43 }
 0x222   :  { %442 = vmax.xlane.f32.xlu2 %v397_v45  ;;  %v387_v45 = vadd.f32 %v2381_v47, %v2446_v20 }
 0x223   :  { %275 = vmax.xlane.f32.xlu1 %v237_v44  ;;  %v391_v44 = vadd.f32 %v2396_v56, %v2446_v20 }
 0x22a   :  { %466 = vmax.xlane.f32.xlu2 %v409_v50  ;;  %v76_v50 = vld [vmem:[%s3511_s6 + $0x8] sm:$0xff]  ;;  %s2194_s6 = smov 32  }
 0x22b   :  { %428 = vmax.xlane.f32.xlu1 %v390_v51  ;;  %vm720_vm9 = vcmp.gt.f32.partialorder %v76_v50, 0.5 }
 0x22c   :  { %v722_v51 = vsel %vm720_vm9, 1, %v2193_v14 }
 0x22d   :  { %v2482_v52 = vpop.xlane.xlu2 %271  ;;  %727 = vperm.xlu0 %2090, %v722_v51   ;;  %v2599_v14 = vpop.xlane.xlu0 %456 }
 0x22e   :  { %v2484_v53 = vpop.xlane.xlu1 %263 }
 0x232   :  { %283 = vmax.xlane.f32.xlu2 %v241_v54 }
 0x233   :  { %444 = vmax.xlane.f32.xlu1 %v398_v55 }
 0x235   :  { %v2490_v58 = vpop.xlane.xlu2 %279 }
 0x236   :  { %v2492_v41 = vpop.xlane.xlu1 %287 }
 0x237   :  { %v339_v25 = vmax.f32 %v2492_v41, -1e+30 }
 0x23a   :  { %291 = vmax.xlane.f32.xlu2 %v245_v60  ;;  %v403_v60 = vadd.f32 %v2383_v48, %v2446_v20 }
 0x23b   :  { %468 = vmax.xlane.f32.xlu1 %v410_v61  ;;  %v399_v61 = vadd.f32 %v2429_v12, %v2446_v20 }
 0x23d   :  { %v2498_v62 = vpop.xlane.xlu2 %416 }
 0x23e   :  { %v2500_v63 = vpop.xlane.xlu1 %295  ;;  %v480_v39 = vmax.f32 %v2498_v62, -1e+30 }
 0x23f   :  { %v343_v47 = vmax.f32 %v2500_v63, -1e+30 }
 0x242   :  { %299 = vmax.xlane.f32.xlu2 %v249_v3 }
 0x243   :  { %277 = vmax.xlane.f32.xlu1 %v238_v0 }
 0x245   :  { %v2506_v4 = vpop.xlane.xlu2 %424 }
 0x246   :  { %v2508_v5 = vpop.xlane.xlu1 %303 }
 0x247   :  { %v347_v56 = vmax.f32 %v2508_v5, -1e+30 }
 0x24a   :  { %307 = vmax.xlane.f32.xlu2 %v253_v6  ;;  %v411_v6 = vadd.f32 %v2438_v19, %v2446_v20  ;;  %v335_v19 = vmax.f32 %v2490_v58, -1e+30 }
 0x24b   :  { %285 = vmax.xlane.f32.xlu1 %v242_v8 }
 0x24d   :  { %v2514_v9 = vpop.xlane.xlu2 %432 }
 0x24e   :  { %v2516_v10 = vpop.xlane.xlu1 %311  ;;  %v488_v49 = vmax.f32 %v2514_v9, -1e+30 }
 0x252   :  { %315 = vmax.xlane.f32.xlu2 %v257_v11 }
 0x253   :  { %293 = vmax.xlane.f32.xlu1 %v246_v13  ;;  %v415_v13 = vadd.f32 %v2398_v57, %v2446_v20 }
 0x255   :  { %v2536_v17 = vpop.xlane.xlu2 %448 }
 0x256   :  { %v2538_v18 = vpop.xlane.xlu1 %319 }
 0x25a   :  { %323 = vmax.xlane.f32.xlu2 %v261_v21  ;;  %v2607_v21 = vpop.xlane.xlu0 %434 }
 0x25b   :  { %301 = vmax.xlane.f32.xlu1 %v250_v22  ;;  %v489_v59 = vmax.f32 %v2607_v21, -1e+30  ;;  %v351_v21 = vmax.f32 %v2516_v10, -1e+30 }
 0x25d   :  { %v2551_v24 = vpop.xlane.xlu2 %472 }
 0x25e   :  { %v2553_v28 = vpop.xlane.xlu1 %440 }
 0x262   :  { %420 = vmax.xlane.f32.xlu2 %v386_v30  ;;  %v3525_v30 = vlaneseq }
 0x263   :  { %309 = vmax.xlane.f32.xlu1 %v254_v31 }
 0x265   :  { %v2559_v29 = vpop.xlane.xlu2 %273 }
 0x266   :  { %v2561_v32 = vpop.xlane.xlu1 %464 }
 0x26a   :  { %452 = vmax.xlane.f32.xlu2 %v402_v33  ;;  %v2612_v33 = vand.u32 127, %v3525_v30  ;;  %v492_v30 = vmax.f32 %v2553_v28, -1e+30  ;;  %v504_v28 = vmax.f32 %v2561_v32, -1e+30 }
 0x26b   :  { %317 = vmax.xlane.f32.xlu1 %v258_v34 }
 0x26c   :  { %v2622_v51 = vadd.s32 4294967280, %v2612_v33  ;;  %v697_v7 = vperm.slane %v504_v28, %v2612_v33  ;;  %v566_v12 = vperm.slane %v335_v19, %v2612_v33  ;;  %v573_v63 = vperm.slane %v339_v25, %v2612_v33 }
 0x26d   :  { %v2567_v35 = vpop.xlane.xlu2 %289  ;;  %v587_v25 = vperm.slane %v347_v56, %v2612_v33 }
 0x26e   :  { %v2569_v36 = vpop.xlane.xlu1 %265  ;;  %v340_v19 = vmax.f32 %v2567_v35, -1e+30 }
 0x26f   :  { %v328_v41 = vmax.f32 %v2569_v36, -1e+30  ;;  %v355_v36 = vmax.f32 %v2538_v18, -1e+30 }
 0x272   :  { %269 = vmax.xlane.f32.xlu2 %v234_v38  ;;  %v2615_v38 = vadd.s32 4294967288, %v2612_v33 }
 0x273   :  { %325 = vmax.xlane.f32.xlu1 %v262_v42  ;;  %v484_v42 = vmax.f32 %v2506_v4, -1e+30 }
 0x274   :  { %v670_v62 = vperm.slane %v489_v59, %v2615_v38  ;;  %v580_v59 = vperm.slane %v343_v47, %v2612_v33  ;;  %v2714_v47 = vadd.s32 4294967272, %v2612_v33 }
 0x275   :  { %v2575_v43 = vpop.xlane.xlu2 %297 }
 0x276   :  { %v2577_v1 = vpop.xlane.xlu1 %281 }
 0x277   :  { %v336_v35 = vmax.f32 %v2577_v1, -1e+30 }
 0x27a   :  { %430 = vmax.xlane.f32.xlu2 %v391_v44 }
 0x27b   :  { %422 = vmax.xlane.f32.xlu1 %v387_v45  ;;  %v2618_v45 = vpop.xlane.xlu0 %450 }
 0x27d   :  { %v2587_v54 = vpop.xlane.xlu2 %305 }
 0x27e   :  { %v2589_v55 = vpop.xlane.xlu1 %418 }
 0x282   :  { %454 = vmax.xlane.f32.xlu2 %v403_v60 }
 0x283   :  { %446 = vmax.xlane.f32.xlu1 %v399_v61  ;;  %v662_v61 = vperm.slane %v484_v42, %v2612_v33  ;;  %v2634_v40 = vpop.xlane.xlu0 %474  ;;  %v676_v42 = vperm.slane %v492_v30, %v2612_v33 }
 0x285   :  { %v2595_v0 = vpop.xlane.xlu2 %313 }
 0x286   :  { %v427_v3 = vpop.xlane.xlu1 %426 }
 0x287   :  { %v485_v34 = vmax.f32 %v427_v3, -1e+30 }
 0x289   :  { %v663_v20 = vperm.slane %v485_v34, %v2615_v38 }
 0x28a   :  { %470 = vmax.xlane.f32.xlu2 %v411_v6 }
 0x28b   :  { %v664_v6 = vsel %vm549_vm10, %v663_v20, %v662_v61  ;;  %v268_v2 = vpop.xlane.xlu0 %267 }
 0x28c   :  { %v329_v37 = vmax.f32 %v268_v2, -1e+30  ;;  %v548_v2 = vperm.slane %v328_v41, %v2615_v38 }
 0x28d   :  { %v2601_v8 = vpop.xlane.xlu2 %321 }
 0x28e   :  { %v2603_v11 = vpop.xlane.xlu1 %458  ;;  %v552_v26 = vperm.slane %v329_v37, %v2622_v51 }
 0x292   :  { %478 = vmax.xlane.f32.xlu2 %v415_v13 }
 0x293   :  { %v437_v32 = vpop.xlane.xlu0 %436 }
 0x294   :  { %v490_v10 = vmax.f32 %v437_v32, -1e+30  ;;  %v344_v32 = vmax.f32 %v2575_v43, -1e+30  ;;  %v352_v43 = vmax.f32 %v2595_v0, -1e+30 }
 0x295   :  { %v443_v22 = vpop.xlane.xlu2 %442  ;;  %v481_v0 = vmax.f32 %v2589_v55, -1e+30 }
 0x296   :  { %v2609_v31 = vpop.xlane.xlu1 %275  ;;  %v493_v13 = vmax.f32 %v443_v22, -1e+30  ;;  %v2720_v37 = vperm.slane %v490_v10, %v2622_v51  ;;  %v581_v10 = vperm.slane %v344_v32, %v2615_v38 }
 0x298   :  { %v677_v57 = vperm.slane %v493_v13, %v2615_v38 }
 0x29a   :  { %v678_v20 = vsel %vm549_vm10, %v677_v57, %v676_v42 }
 0x29b   :  { %v2662_v28 = vpop.xlane.xlu0 %460 }
 0x29d   :  { %v467_v44 = vpop.xlane.xlu2 %466 }
 0x29e   :  { %v429_v50 = vpop.xlane.xlu1 %428  ;;  %v505_v22 = vmax.f32 %v467_v44, -1e+30 }
 0x29f   :  { %v486_v60 = vmax.f32 %v429_v50, -1e+30 }
 0x2a1   :  { %v665_v3 = vperm.slane %v486_v60, %v2622_v51 }
 0x2a3   :  { %v2628_v4 = vsel %vm553_vm11, %v665_v3, %v664_v6  ;;  %v698_v6 = vperm.slane %v505_v22, %v2615_v38 }
 0x2a5   :  { %v2631_v34 = vpop.xlane.xlu2 %283 }
 0x2a6   :  { %v445_v48 = vpop.xlane.xlu1 %444 }
 0x2a7   :  { %v494_v50 = vmax.f32 %v445_v48, -1e+30 }
 0x2a9   :  { %v679_v60 = vperm.slane %v494_v50, %v2622_v51  ;;  %v699_v50 = vsel %vm549_vm10, %v698_v6, %v697_v7  ;;  %v331_v6 = vmax.f32 %v2482_v52, -1e+30 }
 0x2ab   :  { %v2640_v61 = vsel %vm553_vm11, %v679_v60, %v678_v20  ;;  %v559_v52 = vperm.slane %v331_v6, %v2612_v33  ;;  %v669_v6 = vperm.slane %v488_v49, %v2612_v33 }
 0x2ad   :  { %v2643_v3 = vpop.xlane.xlu2 %291  ;;  %v2710_v18 = vsel %vm549_vm10, %v670_v62, %v669_v6  ;;  %v574_v62 = vperm.slane %v340_v19, %v2615_v38  ;;  %v356_v6 = vmax.f32 %v2601_v8, -1e+30 }
 0x2ae   :  { %v469_v13 = vpop.xlane.xlu1 %468 }
 0x2af   :  { %v506_v48 = vmax.f32 %v469_v13, -1e+30  ;;  %v575_v19 = vsel %vm549_vm10, %v574_v62, %v573_v63  ;;  %v602_v32 = vperm.slane %v356_v6, %v2615_v38 }
 0x2b1   :  { %v700_v30 = vperm.slane %v506_v48, %v2622_v51 }
 0x2b3   :  { %v2650_v57 = vsel %vm553_vm11, %v700_v30, %v699_v50  ;;  %v2671_v30 = vpop.xlane.xlu0 %476  ;;  %v327_v50 = vmax.f32 %v2484_v53, -1e+30  ;;  %v332_v53 = vmax.f32 %v2559_v29, -1e+30  ;;  %v761_v29 = vpop.f32.mrf.mxu2 }
 0x2b4   :  { %769 = vrot.lane.b32.xlu2 %v761_v29, %s2194_s6  ;;  %v333_v29 = vmax.f32 %v2609_v31, -1e+30 }
 0x2b5   :  { %v2652_v44 = vpop.xlane.xlu2 %299  ;;  %v546_v58 = vperm.slane %v327_v50, %v2612_v33  ;;  %v2696_v50 = vperm.slane %v480_v39, %v2612_v33  ;;  %v560_v49 = vperm.slane %v332_v53, %v2615_v38  ;;  %v594_v39 = vperm.slane %v351_v21, %v2612_v33 }
 0x2b6   :  { %v2654_v42 = vpop.xlane.xlu1 %277  ;;  %v601_v53 = vperm.slane %v355_v36, %v2612_v33  ;;  %v348_v21 = vmax.f32 %v2587_v54, -1e+30  ;;  %v337_v36 = vmax.f32 %v2631_v34, -1e+30  ;;  %v567_v54 = vperm.slane %v336_v35, %v2615_v38 }
 0x2b7   :  { %v561_v41 = vsel %vm549_vm10, %v560_v49, %v559_v52  ;;  %v550_v1 = vsel %vm549_vm10, %v548_v2, %v546_v58  ;;  %v341_v52 = vmax.f32 %v2643_v3, -1e+30  ;;  %v345_v8 = vmax.f32 %v2652_v44, -1e+30 }
 0x2b8   :  { %v588_v49 = vperm.slane %v348_v21, %v2615_v38  ;;  %v595_v58 = vperm.slane %v352_v43, %v2615_v38  ;;  %v334_v2 = vmax.f32 %v2654_v42, -1e+30  ;;  %v562_v35 = vperm.slane %v333_v29, %v2622_v51 }
 0x2b9   :  { %v554_v55 = vsel %vm553_vm11, %v552_v26, %v550_v1  ;;  %v582_v3 = vsel %vm549_vm10, %v581_v10, %v580_v59  ;;  %v569_v44 = vperm.slane %v337_v36, %v2622_v51  ;;  %v568_v42 = vsel %vm549_vm10, %v567_v54, %v566_v12 }
 0x2ba   :  { %v576_v63 = vperm.slane %v341_v52, %v2622_v51  ;;  %v583_v62 = vperm.slane %v345_v8, %v2622_v51  ;;  %v589_v29 = vsel %vm549_vm10, %v588_v49, %v587_v25  ;;  %v596_v26 = vsel %vm549_vm10, %v595_v58, %v594_v39 }
 0x2bb   :  { %v2716_v56 = vpop.xlane.xlu0 %438  ;;  %v564_v59 = vperm.slane %v334_v2, %v2714_v47  ;;  %v563_v12 = vsel %vm553_vm11, %v562_v35, %v561_v41  ;;  %v570_v10 = vsel %vm553_vm11, %v569_v44, %v568_v42 }
 0x2bc   :  { %v491_v27 = vmax.f32 %v2716_v56, -1e+30  ;;  %v584_v52 = vsel %vm553_vm11, %v583_v62, %v582_v3 }
 0x2bd   :  { %v2656_v60 = vpop.xlane.xlu2 %307  ;;  %v565_v41 = vsel %vm557_vm12, %v564_v59, %v563_v12 }
 0x2be   :  { %v2658_v20 = vpop.xlane.xlu1 %285  ;;  %v349_v34 = vmax.f32 %v2656_v60, -1e+30  ;;  %v2753_v60 = vperm.slane %v481_v0, %v2615_v38  ;;  %v577_v0 = vsel %vm553_vm11, %v576_v63, %v575_v19 }
 0x2bf   :  { %v338_v21 = vmax.f32 %v2658_v20, -1e+30  ;;  %v603_v20 = vsel %vm549_vm10, %v602_v32, %v601_v53 }
 0x2c0   :  { %v590_v6 = vperm.slane %v349_v34, %v2622_v51 }
 0x2c1   :  { %v571_v36 = vperm.slane %v338_v21, %v2714_v47 }
 0x2c3   :  { %v572_v19 = vsel %vm557_vm12, %v571_v36, %v570_v10  ;;  %v463_v56 = vpop.xlane.xlu0 %462 }
 0x2c5   :  { %v2660_v22 = vpop.xlane.xlu2 %315 }
 0x2c6   :  { %v2664_v13 = vpop.xlane.xlu1 %293  ;;  %v353_v43 = vmax.f32 %v2660_v22, -1e+30  ;;  %v501_v22 = vmax.f32 %v2603_v11, -1e+30  ;;  %v3589_v11 = vmax.f32 %v2599_v14, -1e+30 }
 0x2c7   :  { %v342_v1 = vmax.f32 %v2664_v13, -1e+30  ;;  %v591_v13 = vsel %vm553_vm11, %v590_v6, %v589_v29 }
 0x2c8   :  { %v597_v25 = vperm.slane %v353_v43, %v2622_v51 }
 0x2c9   :  { %v578_v34 = vperm.slane %v342_v1, %v2714_v47 }
 0x2cb   :  { %v579_v42 = vsel %vm557_vm12, %v578_v34, %v577_v0  ;;  %v3588_v34 = vmax.f32 %v2536_v17, -1e+30 }
 0x2cd   :  { %v2666_v48 = vpop.xlane.xlu2 %323 }
 0x2ce   :  { %v2668_v7 = vpop.xlane.xlu1 %301  ;;  %v357_v58 = vmax.f32 %v2666_v48, -1e+30 }
 0x2cf   :  { %v346_v39 = vmax.f32 %v2668_v7, -1e+30 }
 0x2d0   :  { %v604_v44 = vperm.slane %v357_v58, %v2622_v51 }
 0x2d1   :  { %v585_v35 = vperm.slane %v346_v39, %v2714_v47 }
 0x2d2   :  { %v605_v10 = vsel %vm553_vm11, %v604_v44, %v603_v20 }
 0x2d5   :  { %v2687_v9 = vpop.xlane.xlu2 %420 }
 0x2d6   :  { %v2693_v5 = vpop.xlane.xlu1 %309  ;;  %v482_v3 = vmax.f32 %v2687_v9, -1e+30  ;;  %v586_v9 = vsel %vm557_vm12, %v585_v35, %v584_v52 }
 0x2d7   :  { %v350_v53 = vmax.f32 %v2693_v5, -1e+30  ;;  %v598_v5 = vsel %vm553_vm11, %v597_v25, %v596_v26 }
 0x2d8   :  { %v658_v26 = vperm.slane %v482_v3, %v2622_v51 }
 0x2d9   :  { %v592_v48 = vperm.slane %v350_v53, %v2714_v47 }
 0x2db   :  { %v593_v59 = vsel %vm557_vm12, %v592_v48, %v591_v13  ;;  %v502_v13 = vmax.f32 %v2662_v28, -1e+30  ;;  %v3587_v28 = vmax.f32 %v2618_v45, -1e+30 }
 0x2dd   :  { %v2733_v15 = vpop.xlane.xlu2 %452  ;;  %v693_v45 = vperm.slane %v502_v13, %v2622_v51 }
 0x2de   :  { %v318_v31 = vpop.xlane.xlu1 %317  ;;  %v498_v20 = vmax.f32 %v2733_v15, -1e+30  ;;  %v691_v15 = vperm.slane %v501_v22, %v2615_v38  ;;  %v503_v22 = vmax.f32 %v463_v56, -1e+30  ;;  %v799_v56 = vld [vmem:[%s3514_s9 + $0x58] sm:$0xff] }
 0x2df   :  { %v354_v2 = vmax.f32 %v318_v31, -1e+30  ;;  %815 = vmatpush.msra.mxu3 %v799_v56 }
 0x2e0   :  { %v695_v14 = vperm.slane %v503_v22, %v2714_v47  ;;  %v2120_v22 = vld [vmem:[%s3568_s22] sm:$0xff] }
 0x2e1   :  { %v599_v21 = vperm.slane %v354_v2, %v2714_v47 }
 0x2e3   :  { %v600_v36 = vsel %vm557_vm12, %v599_v21, %v598_v5 }
 0x2e5   :  { %v270_v54 = vpop.xlane.xlu2 %269 }
 0x2e6   :  { %v330_v8 = vmax.f32 %v270_v54, -1e+30  ;;  %v326_v49 = vpop.xlane.xlu1 %325  ;;  %v674_v54 = vperm.slane %v491_v27, %v2714_v47 }
 0x2e7   :  { %v358_v32 = vmax.f32 %v326_v49, -1e+30 }
 0x2e8   :  { %v556_v7 = vperm.slane %v330_v8, %v2714_v47  ;;  %v657_v8 = vsel %vm549_vm10, %v2753_v60, %v2696_v50  ;;  %v673_v50 = vsel %vm553_vm11, %v2720_v37, %v2710_v18  ;;  %v690_v37 = vperm.slane %v3589_v11, %v2612_v33  ;;  %v2119_v11 = vld [vmem:[%s3507_s2] sm:$0xff] }
 0x2e9   :  { %v606_v62 = vperm.slane %v358_v32, %v2714_v47  ;;  %v659_v27 = vsel %vm553_vm11, %v658_v26, %v657_v8  ;;  %v675_v32 = vsel %vm557_vm12, %v674_v54, %v673_v50  ;;  %v795_v50 = vld [vmem:[%s3514_s9 + $0x38] sm:$0xff] }
 0x2ea   :  { %v558_v31 = vsel %vm557_vm12, %v556_v7, %v554_v55  ;;  %v683_v7 = vperm.slane %v3588_v34, %v2612_v33  ;;  %v692_v17 = vsel %vm549_vm10, %v691_v15, %v690_v37  ;;  %v794_v15 = vld [vmem:[%s3514_s9 + $0x30] sm:$0xff] }
 0x2eb   :  { %v609_v43 = vsel %vm608_vm13, %v565_v41, %v558_v31  ;;  %v607_v52 = vsel %vm557_vm12, %v606_v62, %v605_v10  ;;  %v694_v62 = vsel %vm553_vm11, %v693_v45, %v692_v17  ;;  %v509_v10 = vmax.f32 %v2634_v40, -1e+30  ;;  %v2863_v40 = vpop.permute.xlu0 %727  ;;  %v790_v34 = vld [vmem:[%s3514_s9 + $0x10] sm:$0xff] }
 0x2ec   :  { %v611_v63 = vsel %vm610_vm15, %v572_v19, %v609_v43  ;;  %v686_v19 = vperm.slane %v498_v20, %v2622_v51  ;;  %v764_v43 = vpop.f32.mrf.mxu2  ;;  %v696_v26 = vsel %vm557_vm12, %v695_v14, %v694_v62  ;;  %vm3559_vm9 = vcmp.eq.s32.totalorder %v2863_v40, 1  ;;  %v842_v14 = vld [vmem:[%s3516_s11] sm:$0xff] }
 0x2ed   :  { %v431_v29 = vpop.xlane.xlu2 %430  ;;  %v613_v55 = vsel %vm612_vm1, %v579_v42, %v611_v63  ;;  %v2944_v62 = vld [vmem:[%s3509_s4] sm:$0x3] }
 0x2ee   :  { %v487_v6 = vmax.f32 %v431_v29, -1e+30  ;;  %v423_v12 = vpop.xlane.xlu1 %422  ;;  %v615_v1 = vsel %vm614_vm3, %v586_v9, %v613_v55 }
 0x2ef   :  { %v483_v25 = vmax.f32 %v423_v12, -1e+30  ;;  %v617_v39 = vsel %vm3565_vm4, %v593_v59, %v615_v1 }
 0x2f0   :  { %v667_v0 = vperm.slane %v487_v6, %v2714_v47  ;;  %v619_v53 = vsel %vm3564_vm5, %v600_v36, %v617_v39  ;;  %v508_v36 = vmax.f32 %v2551_v24, -1e+30 }
 0x2f1   :  { %v660_v49 = vperm.slane %v483_v25, %v2714_v47  ;;  %v621_v41 = vsel %vm3562_vm6, %v607_v52, %v619_v53 }
 0x2f2   :  { %v668_v58 = vsel %vm557_vm12, %v667_v0, %v2628_v4  ;;  %v731_v2 = vsel %vm3560_vm14, %v621_v41, 0.0  ;;  %v684_v4 = vperm.slane %v3587_v28, %v2615_v38  ;;  %v705_v0 = vperm.slane %v509_v10, %v2615_v38  ;;  %v792_v28 = vld [vmem:[%s3514_s9 + $0x20] sm:$0xff] }
 0x2f3   :  { %v661_v60 = vsel %vm557_vm12, %v660_v49, %v659_v27  ;;  %777 = vrot.lane.b32.xlu1 %v731_v2, %s2195_s0  ;;  %v704_v52 = vperm.slane %v508_v36, %v2612_v33  ;;  %v798_v27 = vld [vmem:[%s3514_s9 + $0x50] sm:$0xff]  ;;  %v796_v2 = vld [vmem:[%s3514_s9 + $0x40] sm:$0xff]  ;;  %vm3561_vm14 = vcmask 785408  }
 0x2f4   :  { %v711_v18 = vsel %vm608_vm13, %v668_v58, %v661_v60  ;;  %v685_v44 = vsel %vm549_vm10, %v684_v4, %v683_v7  ;;  %v797_v58 = vld [vmem:[%s3514_s9 + $0x48] sm:$0xff]  ;;  %816 = vmatpush.msra.mxu3 %v798_v27  ;;  %v791_v4 = vld [vmem:[%s3514_s9 + $0x18] sm:$0xff] }
 0x2f5   :  { %v455_v5 = vpop.xlane.xlu2 %454  ;;  %v712_v35 = vsel %vm610_vm15, %v675_v32, %v711_v18  ;;  %v687_v42 = vsel %vm553_vm11, %v686_v19, %v685_v44  ;;  %v706_v24 = vsel %vm549_vm10, %v705_v0, %v704_v52  ;;  %v793_v60 = vld [vmem:[%s3514_s9 + $0x28] sm:$0xff]  ;;  %v788_v32 = vld [vmem:[%s3514_s9] sm:$0xff]  ;;  %v845_v44 = vld [vmem:[%s3516_s11 + $0x18] sm:$0xff] }
 0x2f6   :  { %v499_v3 = vmax.f32 %v455_v5, -1e+30  ;;  %v447_v48 = vpop.xlane.xlu1 %446  ;;  %817 = vmatpush.msra.mxu3 %v797_v58  ;;  %v789_v7 = vld [vmem:[%s3514_s9 + $0x8] sm:$0xff]  ;;  %864 = vmatpush.msrb.mxu2 %v845_v44  ;;  %v2030_v44 = vld [vmem:[%s3512_s7 + $0x38] sm:$0xff] }
 0x2f7   :  { %v495_v31 = vmax.f32 %v447_v48, -1e+30  ;;  %v2118_v18 = vld [vmem:[%s3507_s2 + $0x8] sm:$0xff] }
 0x2f8   :  { %v688_v21 = vperm.slane %v499_v3, %v2714_v47  ;;  %818 = vmatpush.msra.mxu3 %v796_v2  ;;  %v2121_v48 = vld [vmem:[%s3568_s22 + $0x8] sm:$0xff]  ;;  %s2198_s22 = smov [#allocation5]  }
 0x2f9   :  { %v681_v63 = vperm.slane %v495_v31, %v2714_v47  ;;  %s1977_s25 = sshll.u32 %s2198_s22, 4  ;;  %s1978_s25 = int_to_ptr.vmem [resolvable:$true] %s1977_s25 }
 0x2fa   :  { %v689_v9 = vsel %vm557_vm12, %v688_v21, %v687_v42  ;;  %819 = vmatpush.msra.mxu3 %v795_v50  ;;  %v844_v21 = vld [vmem:[%s3516_s11 + $0x10] sm:$0xff]  ;;  %v3590_v42 = vlaneseq }
 0x2fb   :  { %v682_v29 = vsel %vm557_vm12, %v681_v63, %v2640_v61  ;;  %771 = vrot.lane.b32.xlu1 %v764_v43, %s2194_s6  ;;  %v510_v61 = vmax.f32 %v2671_v30, -1e+30  ;;  %v843_v43 = vld [vmem:[%s3516_s11 + $0x8] sm:$0xff]  ;;  %865 = vmatpush.msrb.mxu2 %v844_v21  ;;  %v2029_v21 = vld [vmem:[%s3512_s7 + $0x30] sm:$0xff] }
 0x2fc   :  { %v713_v55 = vsel %vm612_vm1, %v682_v29, %v712_v35  ;;  %820 = vmatpush.msra.mxu3 %v794_v15  ;;  %v893_v63 = vshrl.u32 %v3590_v42, 7  ;;  %v2008_v29 = vadd.f32 -1.0, %v2944_v62 }
 0x2fd   :  { %v471_v59 = vpop.xlane.xlu2 %470  ;;  %v714_v6 = vsel %vm614_vm3, %v689_v9, %v713_v55  ;;  %v707_v53 = vperm.slane %v510_v61, %v2622_v51  ;;  %866 = vmatpush.msrb.mxu2 %v843_v43  ;;  %v2028_v43 = vld [vmem:[%s3512_s7 + $0x28] sm:$0xff] }
 0x2fe   :  { %v507_v12 = vmax.f32 %v471_v59, -1e+30  ;;  %v715_v1 = vsel %vm3565_vm4, %v696_v26, %v714_v6  ;;  %821 = vmatpush.msra.mxu3 %v793_v60  ;;  %2091 = vset.pattern.permute.xlu1 %v893_v63  ;;  %v900_v9 = vadd.s32 8, %v893_v63  ;;  %v72_v55 = vmul.f32 1e+30, %v2008_v29 }
 0x2ff   :  { %v708_v30 = vsel %vm553_vm11, %v707_v53, %v706_v24  ;;  %867 = vmatpush.msrb.mxu2 %v842_v14  ;;  %2093 = vset.pattern.permute.xlu0 %v893_v63  ;;  %v2099_v6 = vld [vmem:[%s3515_s10] ss:$0 sm:$0xff]  ;;  %v2197_v63 = vmov 32  }
 0x300   :  { %v702_v25 = vperm.slane %v507_v12, %v2714_v47  ;;  %822 = vmatpush.msra.mxu3 %v792_v28  ;;  %2092 = vset.pattern.permute.xlu2 %v900_v9  ;;  %v891_v26 = vperm.slane %v72_v55, 0  ;;  %v904_v59 = vperm.slane %v72_v55, 1  ;;  %v2027_v14 = vld [vmem:[%s3512_s7 + $0x20] sm:$0xff]  ;;  %s1979_s7 = sshll.u32 %s3521_s16, 4  ;;  %s1993_s16 = sshll.u32 %s3522_s17, 4  ;;  %s1980_s7 = int_to_ptr.hbm [resolvable:$true] %s1979_s7  ;;  %s1994_s16 = int_to_ptr.hbm [resolvable:$true] %s1993_s16 }
 0x302   :  { %v703_v39 = vsel %vm557_vm12, %v702_v25, %v2650_v57  ;;  %823 = vmatpush.msra.mxu3 %v791_v4 }
 0x303   :  { %v716_v54 = vsel %vm3564_vm5, %v703_v39, %v715_v1 }
 0x304   :  { %824 = vmatpush.msra.mxu3 %v790_v34 }
 0x305   :  { %v479_v8 = vpop.xlane.xlu2 %478 }
 0x306   :  { %v511_v20 = vmax.f32 %v479_v8, -1e+30  ;;  %825 = vmatpush.msra.mxu3 %v789_v7  ;;  %896 = vperm.xlu1 %2091, %v891_v26  }
 0x307   :  { %909 = vperm.xlu0 %2093, %v904_v59  }
 0x308   :  { %v709_v49 = vperm.slane %v511_v20, %v2714_v47  ;;  %826 = vmatpush.msra.mxu3 %v788_v32  ;;  %v888_v20 = vstv %s887_s30 }
 0x30a   :  { %v710_v57 = vsel %vm557_vm12, %v709_v49, %v708_v30  ;;  %1175 = vmatpush.msrb.mxu3 %v2118_v18 }
 0x30b   :  { %v717_v41 = vsel %vm3562_vm6, %v710_v57, %v716_v54 }
 0x30c   :  { %v732_v13 = vsel %vm3559_vm9, %v717_v41, 0.0  ;;  %1176 = vmatpush.msrb.mxu3 %v2119_v11  ;;  %vm785_vm9 = vcmask 523264  }
 0x30d   :  { %779 = vrot.lane.b32.xlu2 %v732_v13, %s2195_s0 }
 0x30e   :  { %v770_v37 = vpop.permute.xlu2 %769  ;;  %2094 = vset.pattern.permute.xlu1 %v900_v9 }
 0x30f   :  { %v783_v19 = vsel %vm90_vm0, %v2120_v22, %v770_v37  ;;  %2095 = vset.pattern.permute.xlu0 %v2197_v63 }
 0x315   :  { %902 = vperm.xlu2 %2092, %v891_v26   ;;  %v3591_v26 = vld [vmem:[#allocation27_spill] sm:$0xff] }
 0x316   :  { %915 = vperm.xlu1 %2094, %v904_v59  }
 0x31d   :  { %2097 = vset.pattern.permute.xlu2 %v2197_v63 }
 0x31e   :  { %2096 = vset.pattern.permute.xlu1 %v2197_v63 }
 0x365   :  { %v778_v5 = vpop.permute.xlu1 %777 }
 0x366   :  { %v786_v35 = vsel %vm785_vm9, %v783_v19, %v778_v5 }
 0x367   :  { %2018 = vmatmul.msk.f32.vlgmr.msra.gmra.mxu3 %vm3561_vm14, %v786_v35  ;;  %v780_v3 = vpop.permute.xlu2 %779 }
 0x36d   :  { %v772_v45 = vpop.permute.xlu1 %771 }
 0x36e   :  { %v784_v17 = vsel %vm90_vm0, %v2121_v48, %v772_v45 }
 0x36f   :  { %v787_v31 = vsel %vm785_vm9, %v784_v17, %v780_v3  ;;  %v2965_v30 = vpop.permute.xlu2 %902 }
 0x370   :  { %2019 = vmatmul.msk.f32.gmra.mxu3 %vm3561_vm14, %v787_v31 }
 0x378   :  { %v2960_v8 = vpop.permute.xlu1 %896 }
 0x379   :  { %v2963_v49 = vpop.permute.xlu0 %909 }
 0x388   :  { %v2969_v41 = vpop.permute.xlu1 %915 }
 0x3ea   :  { %v828_v12 = vpop.f32.mrf.mxu3 }
 0x3eb   :  { %v829_v1 = vadd.f32 %v2099_v6, %v828_v12 }
 0x3ed   :  { %vm834_vm14 = vcmp.gt.f32.partialorder %v829_v1, 0.0  ;;  %v836_v10 = vmul.f32 0.01, %v829_v1 }
 0x3ef   :  { %v838_v36 = vsel %vm834_vm14, %v829_v1, %v836_v10  ;;  %vm3563_vm14 = vcmask 269568   ;;  %v2100_v10 = vld [vmem:[%s3517_s12] ss:$0 sm:$0xff] }
 0x3f0   :  { %v2950_v25 = vadd.f32 %v2120_v22, %v838_v36 }
 0x3f2   :  { %2020 = vmatmul.msk.f32.vlgmr.msrb.gmra.mxu2 %vm90_vm0, %v2950_v25 }
 0x3f3   :  { %v831_v61 = vpop.f32.mrf.mxu3 }
 0x3f4   :  { %v832_v39 = vadd.f32 %v2099_v6, %v831_v61 }
 0x3f6   :  { %vm835_vm6 = vcmp.gt.f32.partialorder %v832_v39, 0.0  ;;  %v837_v54 = vmul.f32 0.01, %v832_v39 }
 0x3f8   :  { %v839_v0 = vsel %vm835_vm6, %v832_v39, %v837_v54 }
 0x3f9   :  { %v2954_v52 = vadd.f32 %v2121_v48, %v839_v0 }
 0x3fb   :  { %2021 = vmatmul.msk.f32.gmra.mxu2 %vm90_vm0, %v2954_v52 }
 0x475   :  { %v2958_v53 = vpop.f32.mrf.mxu2 }
 0x476   :  { %v889_v24 = vadd.f32 %v888_v20, %v2958_v53  ;;  %v879_v36 = vadd.f32 %v2100_v10, %v2958_v53 }
 0x478   :  { %v917_v13 = vadd.f32 %v2960_v8, %v889_v24  ;;  %v919_v56 = vadd.f32 %v2963_v49, %v889_v24  ;;  %v883_v39 = vmul.f32 0.01, %v879_v36  ;;  %vm881_vm6 = vcmp.gt.f32.partialorder %v879_v36, 0.0 }
 0x47a   :  { %v931_v50 = vsel %vm3563_vm14, %v919_v56, -inf  ;;  %v922_v15 = vsel %vm3563_vm14, %v917_v13, -inf }
 0x47e   :  { %v2967_v57 = vpop.f32.mrf.mxu2 }
 0x47f   :  { %v890_v27 = vadd.f32 %v888_v20, %v2967_v57  ;;  %v880_v61 = vadd.f32 %v2100_v10, %v2967_v57  ;;  %v885_v20 = vsel %vm881_vm6, %v879_v36, %v883_v39  ;;  %v3062_v10 = vld [vmem:[%s3510_s5] sm:$0xff]  ;;  %v3069_v36 = vld [vmem:[%s3510_s5 + $0x8] sm:$0xff] }
 0x481   :  { %v918_v58 = vadd.f32 %v2965_v30, %v890_v27  ;;  %v920_v2 = vadd.f32 %v2969_v41, %v890_v27  ;;  %v884_v54 = vmul.f32 0.01, %v880_v61 }
 0x483   :  { %v923_v60 = vsel %vm3563_vm14, %v918_v58, -inf  ;;  %v932_v28 = vsel %vm3563_vm14, %v920_v2, -inf  ;;  %vm882_vm14 = vcmp.gt.f32.partialorder %v880_v61, 0.0 }
 0x484   :  { %v924_v4 = vmax.f32 %v922_v15, %v923_v60  ;;  %v933_v34 = vmax.f32 %v931_v50, %v932_v28  ;;  %v2101_v50 = vld [vmem:[%s3513_s8 + $0x1] ss:$0 sm:$0xff] }
 0x486   :  { %v925_v7 = vrot.slane %v924_v4, 4  ;;  %v934_v32 = vrot.slane %v933_v34, 4 }
 0x488   :  { %v926_v18 = vmax.f32 %v924_v4, %v925_v7  ;;  %v935_v11 = vmax.f32 %v933_v34, %v934_v32  ;;  %v1052_v4 = vld [vmem:[%s3518_s13 + $0x38] sm:$0xff]  ;;  %v1050_v34 = vld [vmem:[%s3518_s13 + $0x28] sm:$0xff]  ;;  %v1049_v7 = vld [vmem:[%s3518_s13 + $0x20] sm:$0xff] }
 0x489   :  { %1068 = vmatpush.msrb.mxu1 %v1052_v4  ;;  %v1048_v32 = vld [vmem:[%s3518_s13 + $0x18] sm:$0xff] }
 0x48a   :  { %v927_v37 = vrot.slane %v926_v18, 2  ;;  %v936_v22 = vrot.slane %v935_v11, 2 }
 0x48c   :  { %v928_v19 = vmax.f32 %v926_v18, %v927_v37  ;;  %v937_v5 = vmax.f32 %v935_v11, %v936_v22  ;;  %v1047_v18 = vld [vmem:[%s3518_s13 + $0x10] sm:$0xff]  ;;  %v1046_v11 = vld [vmem:[%s3518_s13 + $0x8] sm:$0xff]  ;;  %v1045_v37 = vld [vmem:[%s3518_s13] sm:$0xff] }
 0x48e   :  { %v929_v35 = vrot.slane %v928_v19, 1  ;;  %v938_v45 = vrot.slane %v937_v5, 1 }
 0x490   :  { %v930_v3 = vmax.f32 %v928_v19, %v929_v35  ;;  %v939_v48 = vmax.f32 %v937_v5, %v938_v45 }
 0x492   :  { %v942_v17 = vsel %vm608_vm13, %v939_v48, %v930_v3 }
 0x493   :  { %943 = vrot.lane.b32.xlu2 %v942_v17, %s2196_s18 }
 0x4ed   :  { %v944_v31 = vpop.permute.xlu2 %943 }
 0x4ee   :  { %2022 = vmatpush.msk.msrb.mxu0 %vm740_vm7, %v944_v31 }
 0x4ef   :  { %2023 = vmatmul.msk.f32.vlgmr.msrb.gmra.mxu0 %vm733_vm8, %v2532_v16 }
 0x4f0   :  { %1106 = vmatpush.msra.mxu0 %v2030_v44 }
 0x4f2   :  { %1107 = vmatpush.msra.mxu0 %v2029_v21 }
 0x4f4   :  { %1108 = vmatpush.msra.mxu0 %v2028_v43 }
 0x4f6   :  { %1109 = vmatpush.msra.mxu0 %v2027_v14 }
 0x4f7   :  { %2024 = vmatmul.msk.f32.gmra.mxu0 %vm733_vm8, %v2547_v23 }
 0x4ff   :  { %2032 = vmatmul.msk.f32.vlgmr.msra.gmra.mxu0 %vm90_vm0, %v2950_v25 }
 0x507   :  { %2033 = vmatmul.msk.f32.gmra.mxu0 %vm90_vm0, %v2954_v52 }
 0x56c   :  { %v964_v16 = vpop.f32.mrf.mxu0 }
 0x56d   :  { %972 = vrot.lane.b32.xlu2 %v964_v16, %s2194_s6 }
 0x574   :  { %v967_v42 = vpop.f32.mrf.mxu0 }
 0x575   :  { %974 = vrot.lane.b32.xlu1 %v967_v42, %s2194_s6 }
 0x57c   :  { %v1111_v57 = vpop.f32.mrf.mxu0 }
 0x57d   :  { %v1112_v15 = vadd.f32 %v2101_v50, %v1111_v57 }
 0x584   :  { %v1114_v60 = vpop.f32.mrf.mxu0 }
 0x585   :  { %v1115_v28 = vadd.f32 %v2101_v50, %v1114_v60 }
 0x5c7   :  { %v973_v9 = vpop.permute.xlu2 %972 }
 0x5c8   :  { %v978_v29 = vsub.f32 %v889_v24, %v973_v9  ;;  %v886_v24 = vsel %vm882_vm14, %v880_v61, %v884_v54 }
 0x5ca   :  { %v980_v55 = vmul.f32 1.442695, %v978_v29 }
 0x5cc   :  { %2106 = vpow2.f32 %v980_v55  ;;  %v2102_v55 = vld [vmem:[%s3519_s14] ss:$0 sm:$0xff] }
 0x5d2   :  { %v2107_v23 = vpop.eup %2106 }
 0x5d3   :  { %986 = vperm.xlu1 %2096, %v2107_v23  }
 0x5db   :  { %1041 = vrot.lane.b32.xlu1 %v3591_v26, %s2194_s6 }
 0x5e7   :  { %v975_v59 = vpop.permute.xlu1 %974 }
 0x5e8   :  { %v979_v6 = vsub.f32 %v890_v27, %v975_v59 }
 0x5ea   :  { %v982_v12 = vmul.f32 1.442695, %v979_v6 }
 0x5ec   :  { %2108 = vpow2.f32 %v982_v12  ;;  %v2122_v12 = vld [vmem:[%s3585_s23] sm:$0x3] }
 0x5f2   :  { %v2109_v1 = vpop.eup %2108 }
 0x5f3   :  { %991 = vperm.xlu0 %2095, %v2109_v1  }
 0x645   :  { %v987_v0 = vpop.permute.xlu1 %986 }
 0x646   :  { %v994_v56 = vmul.f32 %v987_v0, %v885_v20  ;;  %v3592_v0 = vld [vmem:[#allocation13_spill] sm:$0xff] }
 0x648   :  { %v996_v2 = vsel %vm90_vm0, %v994_v56, %v2107_v23 }
 0x64d   :  { %v1042_v43 = vpop.permute.xlu1 %1041 }
 0x665   :  { %v992_v13 = vpop.permute.xlu0 %991 }
 0x666   :  { %v995_v27 = vmul.f32 %v992_v13, %v886_v24 }
 0x668   :  { %v997_v58 = vsel %vm90_vm0, %v995_v27, %v2109_v1  ;;  %v3593_v27 = vld [vmem:[#allocation12_spill] sm:$0xff] }
 0x669   :  { %1015 = vmatpush.msra.mxu2 %v997_v58 }
 0x66b   :  { %1016 = vmatpush.msra.mxu2 %v996_v2 }
 0x66c   :  { %2025 = vmatmul.msk.f32.vlgmr.msra.gmra.mxu2 %vm152_vm2, %v2944_v62  ;;  %v1051_v62 = vld [vmem:[%s3518_s13 + $0x30] sm:$0xff] }
 0x66d   :  { %1069 = vmatpush.msrb.mxu1 %v1051_v62  ;;  %v3594_v62 = vld [vmem:[#allocation14_spill] sm:$0xff] }
 0x66f   :  { %1070 = vmatpush.msrb.mxu1 %v1050_v34 }
 0x671   :  { %1071 = vmatpush.msrb.mxu1 %v1049_v7 }
 0x673   :  { %1072 = vmatpush.msrb.mxu1 %v1048_v32  ;;  %v3595_v32 = vld [vmem:[#allocation20_spill] sm:$0xff] }
 0x675   :  { %1073 = vmatpush.msrb.mxu1 %v1047_v18 }
 0x677   :  { %1074 = vmatpush.msrb.mxu1 %v1046_v11 }
 0x679   :  { %1075 = vmatpush.msrb.mxu1 %v1045_v37 }
 0x6ef   :  { %v1018_v53 = vpop.f32.mrf.mxu2 }
 0x6f0   :  { %1023 = vperm.xlu2 %2097, %v1018_v53  }
 0x716   :  { %1117 = vxpose.xlu2.b32.start [1/2] (short) (narrow) %v1112_v15, 32 }
 0x71e   :  { %1118 = vxpose.xlu2.b32.end [2/2] (short) (narrow) %v1115_v28, 32 }
 0x74a   :  { %v1024_v22 = vpop.permute.xlu2 %1023 }
 0x74b   :  { %2110 = vrcp.f32 %v1024_v22  ;;  %v1037_v45 = vand.u32 2147483648, %v1024_v22  ;;  %v1035_v48 = vand.u32 2147483647, %v1024_v22  ;;  %vm1031_vm6 = vweird.f32 %v1024_v22 }
 0x74d   :  { %v1038_v31 = vor.u32 1.1754944e-38, %v1037_v45  ;;  %vm1036_vm4 = vcmp.eq.f32.partialorder %v1035_v48, 8.507059e+37  ;;  %v3597_v45 = vld [vmem:[#allocation15_spill] sm:$0xff] }
 0x751   :  { %v2111_v19 = vpop.eup %2110 }
 0x752   :  { %v1027_v5 = vmul.f32 %v2111_v19, %v1024_v22  ;;  %vm1032_vm14 = vweird.f32 %v2111_v19 }
 0x753   :  { %vm1033_vm5 = vmor %vm1031_vm6, %vm1032_vm14 }
 0x754   :  { %v1028_v35 = vsub.f32 1.0, %v1027_v5  ;;  %v3596_v5 = vld [vmem:[#allocation17_spill] sm:$0xff] }
 0x756   :  { %v1029_v3 = vmul.f32 %v2111_v19, %v1028_v35 }
 0x758   :  { %v1030_v17 = vadd.f32 %v2111_v19, %v1029_v3 }
 0x75a   :  { %v1034_v44 = vsel %vm1033_vm5, %v2111_v19, %v1030_v17  ;;  %v3598_v17 = vld [vmem:[#allocation25_spill] sm:$0xff] }
 0x75b   :  { %v1039_v21 = vsel %vm1036_vm4, %v1038_v31, %v1034_v44 }
 0x75c   :  { %v1040_v14 = vmul.f32 %v1039_v21, %v1018_v53 }
 0x75e   :  { %v1044_v16 = vsel %vm90_vm0, %v1040_v14, %v1042_v43  ;;  %v3599_v14 = vld [vmem:[#allocation19_spill] sm:$0xff] }
 0x75f   :  { %2026 = vmatmul.msk.f32.vlgmr.msrb.gmra.mxu1 %vm785_vm9, %v1044_v16 }
 0x7af   :  { %v1133_v42 = vpop.trf.xlu2 }
 0x7b0   :  { %2034 = vmatmul.msk.f32.vlgmr.msrb.gmra.mxu3 %vm152_vm2, %v1133_v42 }
 0x7b7   :  { %v1134_v63 = vpop.trf.xlu2 }
 0x7b8   :  { %2035 = vmatmul.msk.f32.gmra.mxu3 %vm152_vm2, %v1134_v63 }
 0x7bf   :  { %v1135_v9 = vpop.trf.xlu2 }
 0x7c0   :  { %2036 = vmatmul.msk.f32.gmra.mxu3 %vm152_vm2, %v1135_v9 }
 0x7c7   :  { %v1136_v29 = vpop.trf.xlu2 }
 0x7c8   :  { %2037 = vmatmul.msk.f32.gmra.mxu3 %vm152_vm2, %v1136_v29 }
 0x7dc   :  { %v1077_v23 = vpop.f32.mrf.mxu1 }
 0x7dd   :  { %v1078_v26 = vadd.f32 %v2102_v55, %v1077_v23  ;;  %v3600_v55 = vld [vmem:[#allocation11_spill] sm:$0xff] }
 0x7df   :  { %vm1080_vm4 = vcmp.gt.f32.partialorder %v1078_v26, 0.0  ;;  %v1081_v59 = vmul.f32 0.01, %v1078_v26 }
 0x7e1   :  { %v1082_v6 = vsel %vm1080_vm4, %v1078_v26, %v1081_v59  ;;  %v3601_v26 = vld [vmem:[#allocation22_spill] sm:$0xff] }
 0x7e2   :  { %v3055_v1 = vadd.f32 %v2122_v12, %v1082_v6  ;;  %v3602_v12 = vld [vmem:[#allocation26_spill] sm:$0xff] }
 0x7e4   :  { %2038 = vmatpush.msk.msrb.mxu2 %vm740_vm7, %v3055_v1 }
 0x7e5   :  { %2039 = vmatmul.msk.f32.vlgmr.msrb.gmra.mxu2 %vm733_vm8, %v3062_v10 }
 0x7ed   :  { %2040 = vmatmul.msk.f32.gmra.mxu2 %vm733_vm8, %v3069_v36 }
 0x833   :  { %v1178_v61 = vpop.f32.mrf.mxu3 }
 0x834   :  { %vm1190_vm5 = vcmp.gt.f32.partialorder %v1178_v61, 0.0  ;;  %v1194_v39 = vmul.f32 0.01, %v1178_v61 }
 0x836   :  { %v3073_v54 = vsel %vm1190_vm5, %v1178_v61, %v1194_v39  ;;  %vm3608_vm5 = vcmask 1045509  }
 0x837   :  { %v1202_v20 = vadd.f32 %v3073_v54, %v3592_v0  ;;  %v1206_v58 = vadd.f32 %v3073_v54, %v3593_v27  ;;  %v1210_v34 = vadd.f32 %v3073_v54, %v3594_v62  ;;  %v1214_v3 = vadd.f32 %v3073_v54, %v3597_v45 }
 0x838   :  { %v1342_v31 = vadd.f32 %v3073_v54, %v3598_v17  ;;  %v1218_v16 = vadd.f32 %v3073_v54, %v3599_v14  ;;  %v1222_v59 = vadd.f32 %v3073_v54, %v3601_v26  ;;  %v1354_v61 = vadd.f32 %v3073_v54, %v3602_v12 }
 0x839   :  { %1234 = vmax.xlane.f32.xlu0 %v1202_v20 }
 0x83b   :  { %v1181_v24 = vpop.f32.mrf.mxu3 }
 0x83c   :  { %vm1191_vm14 = vcmp.gt.f32.partialorder %v1181_v24, 0.0  ;;  %v1195_v13 = vmul.f32 0.01, %v1181_v24 }
 0x83e   :  { %v3077_v56 = vsel %vm1191_vm14, %v1181_v24, %v1195_v13  ;;  %v3603_v24 = vld [vmem:[#allocation23_spill] sm:$0xff]  ;;  %vm3609_vm14 = vcmask 1046534  }
 0x83f   :  { %v1203_v2 = vadd.f32 %v3077_v56, %v3592_v0  ;;  %v1207_v15 = vadd.f32 %v3077_v56, %v3593_v27  ;;  %v1211_v7 = vadd.f32 %v3077_v56, %v3594_v62  ;;  %v1215_v21 = vadd.f32 %v3077_v56, %v3597_v45 }
 0x840   :  { %v1219_v29 = vadd.f32 %v3077_v56, %v3599_v14  ;;  %v1351_v23 = vadd.f32 %v3077_v56, %v3600_v55  ;;  %v1226_v13 = vadd.f32 %v3073_v54, %v3603_v24 }
 0x841   :  { %1242 = vmax.xlane.f32.xlu0 %v1206_v58  ;;  %1236 = vmax.xlane.f32.xlu1 %v1203_v2 }
 0x843   :  { %v1184_v53 = vpop.f32.mrf.mxu3 }
 0x844   :  { %vm1192_vm6 = vcmp.gt.f32.partialorder %v1184_v53, 0.0  ;;  %v1196_v57 = vmul.f32 0.01, %v1184_v53 }
 0x846   :  { %v3083_v50 = vsel %vm1192_vm6, %v1184_v53, %v1196_v57  ;;  %v1227_v53 = vadd.f32 %v3077_v56, %v3603_v24  ;;  %v3604_v57 = vld [vmem:[#allocation24_spill] sm:$0xff]  ;;  %vm3610_vm6 = vcmask 1047559  }
 0x847   :  { %v1208_v60 = vadd.f32 %v3083_v50, %v3593_v27  ;;  %v1204_v28 = vadd.f32 %v3083_v50, %v3592_v0  ;;  %v1336_v18 = vadd.f32 %v3083_v50, %v3595_v32  ;;  %v1212_v48 = vadd.f32 %v3083_v50, %v3594_v62 }
 0x848   :  { %v1344_v43 = vadd.f32 %v3083_v50, %v3598_v17  ;;  %v1216_v42 = vadd.f32 %v3083_v50, %v3597_v45  ;;  %v1220_v6 = vadd.f32 %v3083_v50, %v3599_v14  ;;  %v1356_v20 = vadd.f32 %v3083_v50, %v3602_v12 }
 0x849   :  { %1244 = vmax.xlane.f32.xlu1 %v1207_v15  ;;  %1246 = vmax.xlane.f32.xlu0 %v1208_v60  ;;  %v1230_v15 = vadd.f32 %v3073_v54, %v3604_v57  ;;  %v1228_v60 = vadd.f32 %v3083_v50, %v3603_v24 }
 0x84a   :  { %1238 = vmax.xlane.f32.xlu2 %v1204_v28 }
 0x84b   :  { %v1187_v4 = vpop.f32.mrf.mxu3 }
 0x84c   :  { %v1197_v11 = vmul.f32 0.01, %v1187_v4  ;;  %vm1193_vm4 = vcmp.gt.f32.partialorder %v1187_v4, 0.0 }
 0x84e   :  { %v3097_v37 = vsel %vm1193_vm4, %v1187_v4, %v1197_v11  ;;  %v1231_v4 = vadd.f32 %v3077_v56, %v3604_v57  ;;  %vm3611_vm4 = vcmp.eq.s32.totalorder %v2476_v46, 1 }
 0x84f   :  { %v1209_v22 = vadd.f32 %v3097_v37, %v3593_v27  ;;  %v1205_v19 = vadd.f32 %v3097_v37, %v3592_v0  ;;  %v1333_v35 = vadd.f32 %v3097_v37, %v3596_v5  ;;  %v1213_v44 = vadd.f32 %v3097_v37, %v3594_v62 }
 0x850   :  { %v1345_v63 = vadd.f32 %v3097_v37, %v3598_v17  ;;  %v1217_v9 = vadd.f32 %v3097_v37, %v3597_v45  ;;  %v1221_v39 = vadd.f32 %v3097_v37, %v3599_v14  ;;  %v1223_v0 = vadd.f32 %v3077_v56, %v3601_v26 }
 0x851   :  { %1250 = vmax.xlane.f32.xlu1 %v1210_v34  ;;  %1252 = vmax.xlane.f32.xlu0 %v1211_v7  ;;  %v1224_v27 = vadd.f32 %v3083_v50, %v3601_v26  ;;  %v1357_v58 = vadd.f32 %v3097_v37, %v3602_v12  ;;  %v1225_v2 = vadd.f32 %v3097_v37, %v3601_v26 }
 0x852   :  { %1374 = vmax.xlane.f32.xlu2 %v1336_v18  ;;  %v1229_v28 = vadd.f32 %v3097_v37, %v3603_v24  ;;  %v1233_v7 = vadd.f32 %v3097_v37, %v3604_v57  ;;  %v1232_v18 = vadd.f32 %v3083_v50, %v3604_v57  ;;  %v1335_v26 = vadd.f32 %v3077_v56, %v3595_v32 }
 0x859   :  { %1248 = vmax.xlane.f32.xlu0 %v1209_v22  ;;  %1240 = vmax.xlane.f32.xlu1 %v1205_v19 }
 0x85a   :  { %1368 = vmax.xlane.f32.xlu2 %v1333_v35 }
 0x861   :  { %1258 = vmax.xlane.f32.xlu0 %v1214_v3  ;;  %1254 = vmax.xlane.f32.xlu1 %v1212_v48  ;;  %v1331_v48 = vadd.f32 %v3077_v56, %v3596_v5 }
 0x862   :  { %1386 = vmax.xlane.f32.xlu2 %v1342_v31  ;;  %v1330_v31 = vadd.f32 %v3073_v54, %v3596_v5 }
 0x868   :  { %v1672_v62 = vpop.f32.mrf.mxu2 }
 0x869   :  { %1256 = vmax.xlane.f32.xlu0 %v1213_v44  ;;  %1260 = vmax.xlane.f32.xlu1 %v1215_v21 }
 0x86a   :  { %1390 = vmax.xlane.f32.xlu2 %v1344_v43 }
 0x871   :  { %1266 = vmax.xlane.f32.xlu0 %v1218_v16  ;;  %1262 = vmax.xlane.f32.xlu1 %v1216_v42 }
 0x872   :  { %1392 = vmax.xlane.f32.xlu2 %v1345_v63  ;;  %v1334_v63 = vadd.f32 %v3073_v54, %v3595_v32 }
 0x879   :  { %1264 = vmax.xlane.f32.xlu0 %v1217_v9  ;;  %1268 = vmax.xlane.f32.xlu1 %v1219_v29 }
 0x87a   :  { %1404 = vmax.xlane.f32.xlu2 %v1351_v23 }
 0x881   :  { %1274 = vmax.xlane.f32.xlu0 %v1222_v59  ;;  %1270 = vmax.xlane.f32.xlu1 %v1220_v6 }
 0x882   :  { %1410 = vmax.xlane.f32.xlu2 %v1354_v61 }
 0x889   :  { %1272 = vmax.xlane.f32.xlu0 %v1221_v39  ;;  %1276 = vmax.xlane.f32.xlu1 %v1223_v0 }
 0x88a   :  { %1414 = vmax.xlane.f32.xlu2 %v1356_v20 }
 0x891   :  { %1282 = vmax.xlane.f32.xlu0 %v1226_v13  ;;  %1278 = vmax.xlane.f32.xlu1 %v1224_v27 }
 0x892   :  { %1416 = vmax.xlane.f32.xlu2 %v1357_v58  ;;  %v3605_v58 = vld [vmem:[#allocation16_spill] sm:$0xff] }
 0x899   :  { %1280 = vmax.xlane.f32.xlu0 %v1225_v2  ;;  %1284 = vmax.xlane.f32.xlu1 %v1227_v53  ;;  %v1338_v2 = vadd.f32 %v3073_v54, %v3605_v58  ;;  %v1332_v53 = vadd.f32 %v3083_v50, %v3596_v5  ;;  %v1339_v5 = vadd.f32 %v3077_v56, %v3605_v58 }
 0x8a1   :  { %1290 = vmax.xlane.f32.xlu0 %v1230_v15  ;;  %1286 = vmax.xlane.f32.xlu1 %v1228_v60 }
 0x8a9   :  { %1288 = vmax.xlane.f32.xlu0 %v1229_v28  ;;  %1292 = vmax.xlane.f32.xlu1 %v1231_v4 }
 0x8aa   :  { %1680 = vrot.lane.b32.xlu2 %v1672_v62, %s2194_s6 }
 0x8ac   :  { %v1235_v34 = vpop.xlane.xlu0 %1234 }
 0x8ad   :  { %v1298_v11 = vmax.f32 %v1235_v34, -1e+30 }
 0x8af   :  { %v1490_v45 = vperm.slane %v1298_v11, %v2612_v33  ;;  %v1337_v11 = vadd.f32 %v3097_v37, %v3595_v32  ;;  %v1343_v32 = vadd.f32 %v3077_v56, %v3598_v17 }
 0x8b1   :  { %1296 = vmax.xlane.f32.xlu0 %v1233_v7  ;;  %1294 = vmax.xlane.f32.xlu1 %v1232_v18 }
 0x8b4   :  { %v1243_v22 = vpop.xlane.xlu0 %1242  ;;  %v1237_v19 = vpop.xlane.xlu1 %1236 }
 0x8b5   :  { %v1299_v35 = vmax.f32 %v1237_v19, -1e+30  ;;  %v1302_v21 = vmax.f32 %v1243_v22, -1e+30 }
 0x8b7   :  { %v1491_v3 = vperm.slane %v1299_v35, %v2615_v38  ;;  %v1497_v9 = vperm.slane %v1302_v21, %v2612_v33 }
 0x8b9   :  { %v1492_v44 = vsel %vm549_vm10, %v1491_v3, %v1490_v45  ;;  %1364 = vmax.xlane.f32.xlu0 %v1331_v48  ;;  %1362 = vmax.xlane.f32.xlu1 %v1330_v31 }
 0x8bc   :  { %v1245_v43 = vpop.xlane.xlu1 %1244  ;;  %v1247_v14 = vpop.xlane.xlu0 %1246 }
 0x8bd   :  { %v1303_v16 = vmax.f32 %v1245_v43, -1e+30  ;;  %v1304_v42 = vmax.f32 %v1247_v14, -1e+30  ;;  %v1239_v0 = vpop.xlane.xlu2 %1238  ;;  %v1340_v43 = vadd.f32 %v3083_v50, %v3605_v58 }
 0x8be   :  { %v1300_v57 = vmax.f32 %v1239_v0, -1e+30 }
 0x8bf   :  { %v1498_v29 = vperm.slane %v1303_v16, %v2615_v38  ;;  %v1500_v23 = vperm.slane %v1304_v42, %v2622_v51 }
 0x8c0   :  { %v1493_v60 = vperm.slane %v1300_v57, %v2622_v51 }
 0x8c1   :  { %v1499_v59 = vsel %vm549_vm10, %v1498_v29, %v1497_v9  ;;  %1372 = vmax.xlane.f32.xlu0 %v1335_v26  ;;  %1370 = vmax.xlane.f32.xlu1 %v1334_v63  ;;  %v3606_v29 = vld [vmem:[#allocation18_spill] sm:$0xff] }
 0x8c2   :  { %v1501_v6 = vsel %vm553_vm11, %v1500_v23, %v1499_v59  ;;  %v1494_v22 = vsel %vm553_vm11, %v1493_v60, %v1492_v44  ;;  %v1346_v23 = vadd.f32 %v3073_v54, %v3606_v29 }
 0x8c4   :  { %v1251_v61 = vpop.xlane.xlu1 %1250  ;;  %v1253_v39 = vpop.xlane.xlu0 %1252 }
 0x8c5   :  { %v1306_v20 = vmax.f32 %v1251_v61, -1e+30  ;;  %v1307_v24 = vmax.f32 %v1253_v39, -1e+30 }
 0x8c7   :  { %v1504_v13 = vperm.slane %v1306_v20, %v2612_v33  ;;  %v1505_v27 = vperm.slane %v1307_v24, %v2615_v38 }
 0x8c9   :  { %v1506_v15 = vsel %vm549_vm10, %v1505_v27, %v1504_v13  ;;  %1378 = vmax.xlane.f32.xlu0 %v1338_v2  ;;  %1366 = vmax.xlane.f32.xlu1 %v1332_v53  ;;  %v1348_v13 = vadd.f32 %v3083_v50, %v3606_v29  ;;  %v1347_v27 = vadd.f32 %v3077_v56, %v3606_v29 }
 0x8cc   :  { %v1249_v28 = vpop.xlane.xlu0 %1248  ;;  %v1241_v4 = vpop.xlane.xlu1 %1240 }
 0x8cd   :  { %v1305_v62 = vmax.f32 %v1249_v28, -1e+30  ;;  %v1301_v34 = vmax.f32 %v1241_v4, -1e+30  ;;  %v1349_v28 = vadd.f32 %v3097_v37, %v3606_v29  ;;  %v1350_v4 = vadd.f32 %v3073_v54, %v3600_v55 }
 0x8cf   :  { %v1502_v7 = vperm.slane %v1305_v62, %v2714_v47  ;;  %v1495_v18 = vperm.slane %v1301_v34, %v2714_v47 }
 0x8d1   :  { %v1503_v19 = vsel %vm557_vm12, %v1502_v7, %v1501_v6  ;;  %v1496_v35 = vsel %vm557_vm12, %v1495_v18, %v1494_v22  ;;  %1376 = vmax.xlane.f32.xlu0 %v1337_v11  ;;  %1380 = vmax.xlane.f32.xlu1 %v1339_v5  ;;  %v1341_v6 = vadd.f32 %v3097_v37, %v3605_v58 }
 0x8d2   :  { %v1546_v45 = vsel %vm608_vm13, %v1503_v19, %v1496_v35  ;;  %v1355_v5 = vadd.f32 %v3077_v56, %v3602_v12  ;;  %v1352_v22 = vadd.f32 %v3083_v50, %v3600_v55 }
 0x8d4   :  { %v1259_v3 = vpop.xlane.xlu0 %1258  ;;  %v1255_v48 = vpop.xlane.xlu1 %1254 }
 0x8d5   :  { %v1308_v31 = vmax.f32 %v1255_v48, -1e+30  ;;  %v1310_v14 = vmax.f32 %v1259_v3, -1e+30  ;;  %v1353_v48 = vadd.f32 %v3097_v37, %v3600_v55 }
 0x8d7   :  { %v1507_v21 = vperm.slane %v1308_v31, %v2622_v51  ;;  %v1511_v26 = vperm.slane %v1310_v14, %v2612_v33 }
 0x8d9   :  { %v1508_v44 = vsel %vm553_vm11, %v1507_v21, %v1506_v15  ;;  %1388 = vmax.xlane.f32.xlu0 %v1343_v32  ;;  %1382 = vmax.xlane.f32.xlu1 %v1340_v43 }
 0x8dc   :  { %v1257_v16 = vpop.xlane.xlu0 %1256  ;;  %v1261_v42 = vpop.xlane.xlu1 %1260 }
 0x8dd   :  { %v1309_v63 = vmax.f32 %v1257_v16, -1e+30  ;;  %v1311_v9 = vmax.f32 %v1261_v42, -1e+30 }
 0x8df   :  { %v1509_v59 = vperm.slane %v1309_v63, %v2714_v47  ;;  %v1512_v17 = vperm.slane %v1311_v9, %v2615_v38 }
 0x8e1   :  { %v1510_v61 = vsel %vm557_vm12, %v1509_v59, %v1508_v44  ;;  %v1513_v39 = vsel %vm549_vm10, %v1512_v17, %v1511_v26  ;;  %1394 = vmax.xlane.f32.xlu0 %v1346_v23  ;;  %1384 = vmax.xlane.f32.xlu1 %v1341_v6 }
 0x8e2   :  { %v1547_v0 = vsel %vm610_vm15, %v1510_v61, %v1546_v45  ;;  %v3607_v45 = vld [vmem:[#allocation21_spill] sm:$0xff] }
 0x8e3   :  { %v1358_v3 = vadd.f32 %v3073_v54, %v3607_v45  ;;  %v1360_v12 = vadd.f32 %v3083_v50, %v3607_v45  ;;  %v1359_v32 = vadd.f32 %v3077_v56, %v3607_v45  ;;  %v1361_v54 = vadd.f32 %v3097_v37, %v3607_v45 }
 0x8e4   :  { %v1267_v20 = vpop.xlane.xlu0 %1266  ;;  %v1263_v24 = vpop.xlane.xlu1 %1262 }
 0x8e5   :  { %v1312_v2 = vmax.f32 %v1263_v24, -1e+30  ;;  %v1314_v42 = vmax.f32 %v1267_v20, -1e+30 }
 0x8e7   :  { %v1514_v58 = vperm.slane %v1312_v2, %v2622_v51 }
 0x8e9   :  { %1398 = vmax.xlane.f32.xlu0 %v1348_v13  ;;  %1396 = vmax.xlane.f32.xlu1 %v1347_v27  ;;  %v1515_v62 = vsel %vm553_vm11, %v1514_v58, %v1513_v39  ;;  %v1518_v39 = vperm.slane %v1314_v42, %v2612_v33 }
 0x8ec   :  { %v1265_v53 = vpop.xlane.xlu0 %1264  ;;  %v1269_v57 = vpop.xlane.xlu1 %1268 }
 0x8ed   :  { %v1313_v15 = vmax.f32 %v1265_v53, -1e+30  ;;  %v1315_v16 = vmax.f32 %v1269_v57, -1e+30 }
 0x8ef   :  { %v1516_v60 = vperm.slane %v1313_v15, %v2714_v47  ;;  %v1519_v26 = vperm.slane %v1315_v16, %v2615_v38 }
 0x8f1   :  { %v1517_v34 = vsel %vm557_vm12, %v1516_v60, %v1515_v62  ;;  %1400 = vmax.xlane.f32.xlu0 %v1349_v28  ;;  %1402 = vmax.xlane.f32.xlu1 %v1350_v4  ;;  %v1520_v2 = vsel %vm549_vm10, %v1519_v26, %v1518_v39 }
 0x8f2   :  { %v3227_v7 = vsel %vm612_vm1, %v1517_v34, %v1547_v0 }
 0x8f4   :  { %v1275_v18 = vpop.xlane.xlu0 %1274  ;;  %v1271_v11 = vpop.xlane.xlu1 %1270 }
 0x8f5   :  { %v1316_v63 = vmax.f32 %v1271_v11, -1e+30  ;;  %v1318_v17 = vmax.f32 %v1275_v18, -1e+30 }
 0x8f7   :  { %v1521_v37 = vperm.slane %v1316_v63, %v2622_v51  ;;  %v1525_v57 = vperm.slane %v1318_v17, %v2612_v33 }
 0x8f9   :  { %1412 = vmax.xlane.f32.xlu0 %v1355_v5  ;;  %1406 = vmax.xlane.f32.xlu1 %v1352_v22  ;;  %v1522_v4 = vsel %vm553_vm11, %v1521_v37, %v1520_v2 }
 0x8fc   :  { %v1273_v19 = vpop.xlane.xlu0 %1272  ;;  %v1277_v35 = vpop.xlane.xlu1 %1276 }
 0x8fd   :  { %v1317_v9 = vmax.f32 %v1273_v19, -1e+30  ;;  %v1319_v29 = vmax.f32 %v1277_v35, -1e+30 }
 0x8ff   :  { %v1523_v20 = vperm.slane %v1317_v9, %v2714_v47  ;;  %v1526_v13 = vperm.slane %v1319_v29, %v2615_v38 }
 0x901   :  { %1418 = vmax.xlane.f32.xlu0 %v1358_v3  ;;  %1408 = vmax.xlane.f32.xlu1 %v1353_v48  ;;  %v1524_v18 = vsel %vm557_vm12, %v1523_v20, %v1522_v4  ;;  %v1527_v11 = vsel %vm549_vm10, %v1526_v13, %v1525_v57 }
 0x904   :  { %v1283_v31 = vpop.xlane.xlu0 %1282  ;;  %v1279_v21 = vpop.xlane.xlu1 %1278 }
 0x905   :  { %v1320_v56 = vmax.f32 %v1279_v21, -1e+30  ;;  %v1322_v0 = vmax.f32 %v1283_v31, -1e+30 }
 0x907   :  { %v1528_v58 = vperm.slane %v1320_v56, %v2622_v51  ;;  %v1532_v62 = vperm.slane %v1322_v0, %v2612_v33 }
 0x909   :  { %1422 = vmax.xlane.f32.xlu0 %v1360_v12  ;;  %1420 = vmax.xlane.f32.xlu1 %v1359_v32  ;;  %v1529_v35 = vsel %vm553_vm11, %v1528_v58, %v1527_v11 }
 0x90c   :  { %v1281_v43 = vpop.xlane.xlu0 %1280  ;;  %v1285_v44 = vpop.xlane.xlu1 %1284 }
 0x90d   :  { %v1323_v59 = vmax.f32 %v1285_v44, -1e+30  ;;  %v1321_v6 = vmax.f32 %v1281_v43, -1e+30 }
 0x90f   :  { %v1533_v53 = vperm.slane %v1323_v59, %v2615_v38  ;;  %v1530_v15 = vperm.slane %v1321_v6, %v2714_v47  ;;  %v1375_v59 = vpop.xlane.xlu2 %1374 }
 0x911   :  { %1424 = vmax.xlane.f32.xlu1 %v1361_v54  ;;  %v1534_v45 = vsel %vm549_vm10, %v1533_v53, %v1532_v62  ;;  %v1531_v31 = vsel %vm557_vm12, %v1530_v15, %v1529_v35  ;;  %v1675_v54 = vpop.f32.mrf.mxu2 }
 0x914   :  { %v1291_v14 = vpop.xlane.xlu0 %1290  ;;  %v1287_v55 = vpop.xlane.xlu1 %1286 }
 0x915   :  { %v1324_v61 = vmax.f32 %v1287_v55, -1e+30  ;;  %v1326_v60 = vmax.f32 %v1291_v14, -1e+30  ;;  %v1549_v14 = vsel %vm614_vm3, %v1524_v18, %v3227_v7 }
 0x916   :  { %v1550_v42 = vsel %vm3608_vm5, %v1531_v31, %v1549_v14 }
 0x917   :  { %v1535_v28 = vperm.slane %v1324_v61, %v2622_v51  ;;  %v1539_v21 = vperm.slane %v1326_v60, %v2612_v33  ;;  %v1369_v13 = vpop.xlane.xlu2 %1368  ;;  %v1432_v60 = vmax.f32 %v1375_v59, -1e+30  ;;  %v2046_v59 = vld [vmem:[%s3514_s9 + $0x88] sm:$0xff] }
 0x919   :  { %v1536_v12 = vsel %vm553_vm11, %v1535_v28, %v1534_v45  ;;  %v1429_v28 = vmax.f32 %v1369_v13, -1e+30  ;;  %v1596_v11 = vperm.slane %v1432_v60, %v2622_v51 }
 0x91c   :  { %v1289_v23 = vpop.xlane.xlu0 %1288  ;;  %v1293_v50 = vpop.xlane.xlu1 %1292 }
 0x91d   :  { %v1325_v24 = vmax.f32 %v1289_v23, -1e+30  ;;  %v1327_v27 = vmax.f32 %v1293_v50, -1e+30 }
 0x91f   :  { %v1537_v34 = vperm.slane %v1325_v24, %v2714_v47  ;;  %v1540_v5 = vperm.slane %v1327_v27, %v2615_v38  ;;  %v1387_v4 = vpop.xlane.xlu2 %1386 }
 0x921   :  { %v1538_v32 = vsel %vm557_vm12, %v1537_v34, %v1536_v12  ;;  %v1541_v55 = vsel %vm549_vm10, %v1540_v5, %v1539_v21  ;;  %v1591_v5 = vperm.slane %v1429_v28, %v2714_v47 }
 0x922   :  { %v1551_v9 = vsel %vm3609_vm14, %v1538_v32, %v1550_v42  ;;  %v2052_v42 = vld [vmem:[%s3514_s9 + $0xb8] sm:$0xff] }
 0x923   :  { %1726 = vmatpush.msra.mxu1 %v2052_v42 }
 0x924   :  { %v1297_v22 = vpop.xlane.xlu0 %1296  ;;  %v1295_v19 = vpop.xlane.xlu1 %1294 }
 0x925   :  { %v1329_v3 = vmax.f32 %v1297_v22, -1e+30  ;;  %v1328_v48 = vmax.f32 %v1295_v19, -1e+30 }
 0x927   :  { %v1544_v43 = vperm.slane %v1329_v3, %v2714_v47  ;;  %v1542_v44 = vperm.slane %v1328_v48, %v2622_v51  ;;  %v1391_v21 = vpop.xlane.xlu2 %1390 }
 0x929   :  { %v1543_v16 = vsel %vm553_vm11, %v1542_v44, %v1541_v55 }
 0x92a   :  { %1682 = vrot.lane.b32.xlu1 %v1675_v54, %s2194_s6  ;;  %v1545_v63 = vsel %vm557_vm12, %v1544_v43, %v1543_v16 }
 0x92b   :  { %v1552_v29 = vsel %vm3610_vm6, %v1545_v63, %v1551_v9  ;;  %v2051_v63 = vld [vmem:[%s3514_s9 + $0xb0] sm:$0xff] }
 0x92c   :  { %v1365_v23 = vpop.xlane.xlu0 %1364  ;;  %v1363_v50 = vpop.xlane.xlu1 %1362  ;;  %v1650_v26 = vsel %vm3611_vm4, %v1552_v29, 0.0  ;;  %1727 = vmatpush.msra.mxu1 %v2051_v63 }
 0x92d   :  { %v1427_v7 = vmax.f32 %v1365_v23, -1e+30  ;;  %v1426_v56 = vmax.f32 %v1363_v50, -1e+30  ;;  %1688 = vrot.lane.b32.xlu0 %v1650_v26, %s2195_s0  ;;  %v2050_v50 = vld [vmem:[%s3514_s9 + $0xa8] sm:$0xff]  ;;  %v2049_v26 = vld [vmem:[%s3514_s9 + $0xa0] sm:$0xff] }
 0x92e   :  { %1728 = vmatpush.msra.mxu1 %v2050_v50 }
 0x92f   :  { %v1587_v17 = vperm.slane %v1427_v7, %v2615_v38  ;;  %v1586_v6 = vperm.slane %v1426_v56, %v2612_v33  ;;  %v3301_v43 = vpop.xlane.xlu2 %1392  ;;  %v2048_v7 = vld [vmem:[%s3514_s9 + $0x98] sm:$0xff]  ;;  %v2047_v56 = vld [vmem:[%s3514_s9 + $0x90] sm:$0xff] }
 0x930   :  { %1729 = vmatpush.msra.mxu1 %v2049_v26 }
 0x931   :  { %v1588_v61 = vsel %vm549_vm10, %v1587_v17, %v1586_v6  ;;  %v1438_v17 = vmax.f32 %v1387_v4, -1e+30  ;;  %v1440_v6 = vmax.f32 %v1391_v21, -1e+30 }
 0x932   :  { %1730 = vmatpush.msra.mxu1 %v2048_v7 }
 0x933   :  { %v1610_v60 = vperm.slane %v1440_v6, %v2622_v51 }
 0x934   :  { %v1373_v39 = vpop.xlane.xlu0 %1372  ;;  %v1371_v37 = vpop.xlane.xlu1 %1370  ;;  %1731 = vmatpush.msra.mxu1 %v2047_v56 }
 0x935   :  { %v1431_v0 = vmax.f32 %v1373_v39, -1e+30  ;;  %v1430_v24 = vmax.f32 %v1371_v37, -1e+30 }
 0x936   :  { %1732 = vmatpush.msra.mxu1 %v2046_v59 }
 0x937   :  { %v1594_v20 = vperm.slane %v1431_v0, %v2615_v38  ;;  %v1593_v46 = vperm.slane %v1430_v24, %v2612_v33  ;;  %v3305_v14 = vpop.xlane.xlu2 %1404 }
 0x939   :  { %v1595_v27 = vsel %vm549_vm10, %v1594_v20, %v1593_v46  ;;  %v2045_v20 = vld [vmem:[%s3514_s9 + $0x80] sm:$0xff] }
 0x93a   :  { %v1597_v19 = vsel %vm553_vm11, %v1596_v11, %v1595_v27  ;;  %1733 = vmatpush.msra.mxu1 %v2045_v20 }
 0x93c   :  { %v3286_v2 = vpop.xlane.xlu0 %1378  ;;  %v1367_v58 = vpop.xlane.xlu1 %1366 }
 0x93d   :  { %v1428_v53 = vmax.f32 %v1367_v58, -1e+30  ;;  %v1434_v13 = vmax.f32 %v3286_v2, -1e+30 }
 0x93f   :  { %v1589_v57 = vperm.slane %v1428_v53, %v2622_v51  ;;  %v3315_v9 = vpop.xlane.xlu2 %1410  ;;  %v2044_v53 = vld [vmem:[%s3514_s9 + $0x78] sm:$0xff] }
 0x940   :  { %1734 = vmatpush.msra.mxu1 %v2044_v53 }
 0x941   :  { %v1590_v15 = vsel %vm553_vm11, %v1589_v57, %v1588_v61  ;;  %v1607_v57 = vperm.slane %v1438_v17, %v2612_v33 }
 0x942   :  { %v1592_v35 = vsel %vm557_vm12, %v1591_v5, %v1590_v15 }
 0x944   :  { %v1377_v62 = vpop.xlane.xlu0 %1376  ;;  %v1381_v34 = vpop.xlane.xlu1 %1380 }
 0x945   :  { %v1433_v18 = vmax.f32 %v1377_v62, -1e+30  ;;  %v1435_v61 = vmax.f32 %v1381_v34, -1e+30  ;;  %v2043_v62 = vld [vmem:[%s3514_s9 + $0x70] sm:$0xff]  ;;  %v1600_v34 = vperm.slane %v1434_v13, %v2612_v33  ;;  %v2041_v13 = vld [vmem:[%s3514_s9 + $0x60] sm:$0xff] }
 0x946   :  { %1735 = vmatpush.msra.mxu1 %v2043_v62 }
 0x947   :  { %v1598_v22 = vperm.slane %v1433_v18, %v2714_v47  ;;  %v3337_v46 = vpop.xlane.xlu2 %1414  ;;  %v1601_v15 = vperm.slane %v1435_v61, %v2615_v38 }
 0x948   :  { %v1452_v59 = vmax.f32 %v3337_v46, -1e+30 }
 0x949   :  { %v1599_v45 = vsel %vm557_vm12, %v1598_v22, %v1597_v19  ;;  %v1602_v21 = vsel %vm549_vm10, %v1601_v15, %v1600_v34 }
 0x94a   :  { %v3297_v3 = vsel %vm608_vm13, %v1599_v45, %v1592_v35 }
 0x94c   :  { %v1389_v48 = vpop.xlane.xlu0 %1388  ;;  %v1383_v31 = vpop.xlane.xlu1 %1382 }
 0x94d   :  { %v1439_v39 = vmax.f32 %v1389_v48, -1e+30  ;;  %v1436_v37 = vmax.f32 %v1383_v31, -1e+30  ;;  %v1441_v48 = vmax.f32 %v3301_v43, -1e+30 }
 0x94e   :  { %v1447_v31 = vmax.f32 %v3305_v14, -1e+30 }
 0x94f   :  { %v1608_v28 = vperm.slane %v1439_v39, %v2615_v38  ;;  %v1603_v4 = vperm.slane %v1436_v37, %v2622_v51  ;;  %v1417_v17 = vpop.xlane.xlu2 %1416  ;;  %v1612_v39 = vperm.slane %v1441_v48, %v2714_v47 }
 0x950   :  { %v1622_v56 = vperm.slane %v1447_v31, %v2615_v38  ;;  %v1453_v53 = vmax.f32 %v1417_v17, -1e+30 }
 0x954   :  { %v3299_v12 = vpop.xlane.xlu0 %1394  ;;  %v1385_v32 = vpop.xlane.xlu1 %1384 }
 0x955   :  { %v1437_v27 = vmax.f32 %v1385_v32, -1e+30  ;;  %v1442_v2 = vmax.f32 %v3299_v12, -1e+30  ;;  %v1450_v32 = vmax.f32 %v3315_v9, -1e+30 }
 0x957   :  { %v1605_v18 = vperm.slane %v1437_v27, %v2714_v47  ;;  %v1628_v37 = vperm.slane %v1450_v32, %v2612_v33  ;;  %v1681_v32 = vpop.permute.xlu2 %1680 }
 0x95c   :  { %v3303_v44 = vpop.xlane.xlu0 %1398  ;;  %v1397_v54 = vpop.xlane.xlu1 %1396 }
 0x95d   :  { %v1443_v58 = vmax.f32 %v1397_v54, -1e+30  ;;  %v1444_v11 = vmax.f32 %v3303_v44, -1e+30  ;;  %v1609_v44 = vsel %vm549_vm10, %v1608_v28, %v1607_v57  ;;  %v1604_v54 = vsel %vm553_vm11, %v1603_v4, %v1602_v21 }
 0x95e   :  { %v1631_v28 = vperm.slane %v1452_v59, %v2622_v51 }
 0x95f   :  { %v1615_v22 = vperm.slane %v1443_v58, %v2615_v38  ;;  %v1617_v63 = vperm.slane %v1444_v11, %v2622_v51 }
 0x964   :  { %v3307_v55 = vpop.xlane.xlu0 %1400  ;;  %v1403_v16 = vpop.xlane.xlu1 %1402 }
 0x965   :  { %v1446_v5 = vmax.f32 %v1403_v16, -1e+30  ;;  %v1445_v19 = vmax.f32 %v3307_v55, -1e+30  ;;  %v1614_v16 = vperm.slane %v1442_v2, %v2612_v33  ;;  %v1606_v55 = vsel %vm557_vm12, %v1605_v18, %v1604_v54 }
 0x966   :  { %v1643_v27 = vsel %vm610_vm15, %v1606_v55, %v3297_v3  ;;  %vm3612_vm15 = vmmov %vm3608_vm5  ;;  %vm3615_vm5 = vcmp.eq.s32.totalorder %v2863_v40, 1  ;;  %v2059_v40 = vld [vmem:[%s3516_s11 + $0x38] sm:$0xff] }
 0x967   :  { %v1621_v43 = vperm.slane %v1446_v5, %v2612_v33  ;;  %v1616_v9 = vsel %vm549_vm10, %v1615_v22, %v1614_v16  ;;  %v1619_v50 = vperm.slane %v1445_v19, %v2714_v47  ;;  %v1633_v19 = vperm.slane %v1453_v53, %v2714_v47  ;;  %1776 = vmatpush.msrb.mxu0 %v2059_v40 }
 0x968   :  { %v1618_v46 = vsel %vm553_vm11, %v1617_v63, %v1616_v9 }
 0x969   :  { %v1620_v57 = vsel %vm557_vm12, %v1619_v50, %v1618_v46 }
 0x96c   :  { %v1413_v29 = vpop.xlane.xlu0 %1412  ;;  %v1407_v23 = vpop.xlane.xlu1 %1406 }
 0x96d   :  { %v1451_v35 = vmax.f32 %v1413_v29, -1e+30  ;;  %v1448_v45 = vmax.f32 %v1407_v23, -1e+30  ;;  %v2042_v23 = vld [vmem:[%s3514_s9 + $0x68] sm:$0xff] }
 0x96e   :  { %1736 = vmatpush.msra.mxu1 %v2042_v23  ;;  %v2103_v23 = vld [vmem:[%s3515_s10 + $0x1] ss:$0 sm:$0xff]  ;;  %s2063_s10 = sld [smem:[#allocation2 + $0x1]] }
 0x96f   :  { %v1629_v26 = vperm.slane %v1451_v35, %v2615_v38  ;;  %v1624_v7 = vperm.slane %v1448_v45, %v2622_v51 }
 0x970   :  { %1737 = vmatpush.msra.mxu1 %v2041_v13 }
 0x971   :  { %v1630_v15 = vsel %vm549_vm10, %v1629_v26, %v1628_v37 }
 0x972   :  { %v1632_v11 = vsel %vm553_vm11, %v1631_v28, %v1630_v15 }
 0x973   :  { %v1634_v45 = vsel %vm557_vm12, %v1633_v19, %v1632_v11 }
 0x974   :  { %v3332_v0 = vpop.xlane.xlu0 %1418  ;;  %v1409_v24 = vpop.xlane.xlu1 %1408 }
 0x975   :  { %v1449_v12 = vmax.f32 %v1409_v24, -1e+30  ;;  %v1454_v6 = vmax.f32 %v3332_v0, -1e+30  ;;  %v1611_v24 = vsel %vm553_vm11, %v1610_v60, %v1609_v44  ;;  %v1623_v0 = vsel %vm549_vm10, %v1622_v56, %v1621_v43  ;;  %v2058_v43 = vld [vmem:[%s3516_s11 + $0x30] sm:$0xff] }
 0x976   :  { %v1625_v60 = vsel %vm553_vm11, %v1624_v7, %v1623_v0  ;;  %v1613_v4 = vsel %vm557_vm12, %v1612_v39, %v1611_v24  ;;  %v1694_v44 = vsel %vm90_vm0, %v2950_v25, %v1681_v32  ;;  %1777 = vmatpush.msrb.mxu0 %v2058_v43  ;;  %v1801_v24 = vstv %s2063_s10 }
 0x977   :  { %v1626_v61 = vperm.slane %v1449_v12, %v2714_v47  ;;  %v1635_v3 = vperm.slane %v1454_v6, %v2612_v33  ;;  %v1644_v62 = vsel %vm612_vm1, %v1613_v4, %v1643_v27  ;;  %vm3613_vm1 = vmmov %vm3609_vm14 }
 0x978   :  { %v1645_v18 = vsel %vm614_vm3, %v1620_v57, %v1644_v62  ;;  %vm3614_vm3 = vmmov %vm3610_vm6  ;;  %vm3618_vm6 = vcmask 269568  }
 0x979   :  { %v1627_v2 = vsel %vm557_vm12, %v1626_v61, %v1625_v60  ;;  %vm3619_vm4 = vmmov %vm3618_vm6 }
 0x97a   :  { %v1646_v35 = vsel %vm3612_vm15, %v1627_v2, %v1645_v18  ;;  %vm3620_vm15 = vmmov %vm3619_vm4 }
 0x97b   :  { %v1647_v31 = vsel %vm3613_vm1, %v1634_v45, %v1646_v35  ;;  %vm3621_vm1 = vmmov %vm3619_vm4 }
 0x97c   :  { %v1421_v42 = vpop.xlane.xlu1 %1420  ;;  %v1423_v14 = vpop.xlane.xlu0 %1422 }
 0x97d   :  { %v1455_v29 = vmax.f32 %v1421_v42, -1e+30  ;;  %v1456_v20 = vmax.f32 %v1423_v14, -1e+30  ;;  %v2057_v14 = vld [vmem:[%s3516_s11 + $0x28] sm:$0xff] }
 0x97e   :  { %1778 = vmatpush.msrb.mxu0 %v2057_v14 }
 0x97f   :  { %v1636_v58 = vperm.slane %v1455_v29, %v2615_v38  ;;  %v1638_v38 = vperm.slane %v1456_v20, %v2622_v51  ;;  %v2056_v29 = vld [vmem:[%s3516_s11 + $0x20] sm:$0xff] }
 0x980   :  { %1779 = vmatpush.msrb.mxu0 %v2056_v29 }
 0x981   :  { %v1637_v5 = vsel %vm549_vm10, %v1636_v58, %v1635_v3  ;;  %vm3616_vm10 = vcmask 785408  }
 0x982   :  { %v1639_v48 = vsel %vm553_vm11, %v1638_v38, %v1637_v5  ;;  %vm3617_vm11 = vmmov %vm3616_vm10 }
 0x984   :  { %v1425_v34 = vpop.xlane.xlu1 %1424 }
 0x985   :  { %v1457_v22 = vmax.f32 %v1425_v34, -1e+30 }
 0x987   :  { %v1640_v33 = vperm.slane %v1457_v22, %v2714_v47 }
 0x989   :  { %v1641_v51 = vsel %vm557_vm12, %v1640_v33, %v1639_v48 }
 0x98a   :  { %v1648_v21 = vsel %vm3614_vm3, %v1641_v51, %v1647_v31 }
 0x98b   :  { %v1651_v12 = vsel %vm3615_vm5, %v1648_v21, 0.0 }
 0x98c   :  { %1690 = vrot.lane.b32.xlu0 %v1651_v12, %s2195_s0 }
 0x99c   :  { %v1683_v16 = vpop.permute.xlu1 %1682 }
 0x99d   :  { %v1695_v42 = vsel %vm90_vm0, %v2954_v52, %v1683_v16 }
 0x99f   :  { %v1689_v47 = vpop.permute.xlu0 %1688 }
 0x9a0   :  { %v1696_v54 = vsel %vm785_vm9, %v1694_v44, %v1689_v47 }
 0x9a1   :  { %2054 = vmatmul.msk.f32.vlgmr.msra.gmra.mxu1 %vm3616_vm10, %v1696_v54 }
 0x9fe   :  { %v1691_v55 = vpop.permute.xlu0 %1690 }
 0x9ff   :  { %v1697_v63 = vsel %vm785_vm9, %v1695_v42, %v1691_v55 }
 0xa00   :  { %2055 = vmatmul.msk.f32.gmra.mxu1 %vm3617_vm11, %v1697_v63 }
 0xa1e   :  { %v1739_v9 = vpop.f32.mrf.mxu1 }
 0xa1f   :  { %v1740_v50 = vadd.f32 %v2103_v23, %v1739_v9 }
 0xa21   :  { %vm1745_vm12 = vcmp.gt.f32.partialorder %v1740_v50, 0.0  ;;  %v1747_v26 = vmul.f32 0.01, %v1740_v50 }
 0xa23   :  { %v1749_v7 = vsel %vm1745_vm12, %v1740_v50, %v1747_v26  ;;  %v2075_v50 = vld [vmem:[%s3518_s13 + $0x78] sm:$0xff]  ;;  %v2074_v26 = vld [vmem:[%s3518_s13 + $0x70] sm:$0xff] }
 0xa24   :  { %v1751_v56 = vadd.f32 %v1749_v7, %v2950_v25  ;;  %1953 = vmatpush.msra.mxu3 %v2075_v50  ;;  %v2073_v7 = vld [vmem:[%s3518_s13 + $0x68] sm:$0xff] }
 0xa26   :  { %1969 = vst.msk [vmem:[#allocation5] sm:$0xff] %vm90_vm0, %v1751_v56  ;;  %2060 = vmatmul.msk.f32.vlgmr.msrb.gmra.mxu0 %vm90_vm0, %v1751_v56  ;;  %1954 = vmatpush.msra.mxu3 %v2074_v26  ;;  %v2072_v56 = vld [vmem:[%s3518_s13 + $0x60] sm:$0xff] }
 0xa28   :  { %1955 = vmatpush.msra.mxu3 %v2073_v7 }
 0xa2a   :  { %1956 = vmatpush.msra.mxu3 %v2072_v56 }
 0xa7d   :  { %v1742_v59 = vpop.f32.mrf.mxu1 }
 0xa7e   :  { %v1743_v17 = vadd.f32 %v2103_v23, %v1742_v59  ;;  %v2125_v23 = vld [vmem:[%s3509_s4] sm:$0x3]  ;;  %v2071_v59 = vld [vmem:[%s3518_s13 + $0x58] sm:$0xff] }
 0xa7f   :  { %1957 = vmatpush.msra.mxu3 %v2071_v59 }
 0xa80   :  { %vm1746_vm14 = vcmp.gt.f32.partialorder %v1743_v17, 0.0  ;;  %v1748_v6 = vmul.f32 0.01, %v1743_v17 }
 0xa82   :  { %v1750_v61 = vsel %vm1746_vm14, %v1743_v17, %v1748_v6  ;;  %v2070_v17 = vld [vmem:[%s3518_s13 + $0x50] sm:$0xff]  ;;  %v2069_v6 = vld [vmem:[%s3518_s13 + $0x48] sm:$0xff] }
 0xa83   :  { %v1752_v39 = vadd.f32 %v1750_v61, %v2954_v52  ;;  %1958 = vmatpush.msra.mxu3 %v2070_v17  ;;  %v2068_v61 = vld [vmem:[%s3518_s13 + $0x40] sm:$0xff] }
 0xa85   :  { %2061 = vmatmul.msk.f32.gmra.mxu0 %vm90_vm0, %v1752_v39  ;;  %1970 = vst.msk [vmem:[#allocation5 + $0x8] sm:$0xff] %vm90_vm0, %v1752_v39  ;;  %1959 = vmatpush.msra.mxu3 %v2069_v6 }
 0xa86   :  { %1985 = dma.vmem_to_hbm [thread:$0]  %s1978_s25, 256, %s1980_s7, [#allocation3], %s2199_s26, %s2199_s26, %s2200_s27  }
 0xa87   :  { %1960 = vmatpush.msra.mxu3 %v2068_v61 }
 0xaa3   :  { %v1781_v37 = vpop.f32.mrf.mxu0 }
 0xaa4   :  { %v1802_v20 = vadd.f32 %v1801_v24, %v1781_v37 }
 0xaa6   :  { %v1804_v13 = vadd.f32 %v1802_v20, %v2960_v8  ;;  %v1806_v27 = vadd.f32 %v1802_v20, %v2963_v49 }
 0xaa8   :  { %v1808_v52 = vsel %vm3618_vm6, %v1804_v13, -inf  ;;  %v1817_v53 = vsel %vm3619_vm4, %v1806_v27, -inf }
 0xb02   :  { %v1784_v25 = vpop.f32.mrf.mxu0 }
 0xb03   :  { %v1803_v46 = vadd.f32 %v1801_v24, %v1784_v25 }
 0xb05   :  { %v1805_v0 = vadd.f32 %v1803_v46, %v2965_v30  ;;  %v1807_v58 = vadd.f32 %v1803_v46, %v2969_v41 }
 0xb07   :  { %v1809_v57 = vsel %vm3620_vm15, %v1805_v0, -inf  ;;  %v1818_v15 = vsel %vm3621_vm1, %v1807_v58, -inf }
 0xb08   :  { %v1810_v60 = vmax.f32 %v1808_v52, %v1809_v57  ;;  %v1819_v28 = vmax.f32 %v1817_v53, %v1818_v15 }
 0xb0a   :  { %v1811_v4 = vrot.slane %v1810_v60, 4  ;;  %v1820_v3 = vrot.slane %v1819_v28, 4 }
 0xb0c   :  { %v1812_v8 = vmax.f32 %v1810_v60, %v1811_v4  ;;  %v1821_v2 = vmax.f32 %v1819_v28, %v1820_v3  ;;  %v2105_v60 = vld [vmem:[%s3519_s14 + $0x1] ss:$0 sm:$0xff] }
 0xb0e   :  { %v1813_v49 = vrot.slane %v1812_v8, 2  ;;  %v1822_v62 = vrot.slane %v1821_v2, 2 }
 0xb10   :  { %v1814_v38 = vmax.f32 %v1812_v8, %v1813_v49  ;;  %v1823_v30 = vmax.f32 %v1821_v2, %v1822_v62 }
 0xb12   :  { %v1815_v34 = vrot.slane %v1814_v38, 1  ;;  %v1824_v41 = vrot.slane %v1823_v30, 1 }
 0xb14   :  { %v1816_v18 = vmax.f32 %v1814_v38, %v1815_v34  ;;  %v1825_v11 = vmax.f32 %v1823_v30, %v1824_v41 }
 0xb16   :  { %v1828_v5 = vsel %vm608_vm13, %v1825_v11, %v1816_v18 }
 0xb17   :  { %1829 = vrot.lane.b32.xlu2 %v1828_v5, %s2196_s18  ;;  %s2201_s18 = smov [#allocation6]  }
 0xb71   :  { %v1830_v22 = vpop.permute.xlu2 %1829 }
 0xb72   :  { %2064 = vmatpush.msk.msra.mxu2 %vm740_vm7, %v1830_v22 }
 0xb73   :  { %2065 = vmatmul.msk.f32.vlgmr.msra.gmra.mxu2 %vm733_vm8, %v3062_v10 }
 0xb7b   :  { %2066 = vmatmul.msk.f32.gmra.mxu2 %vm733_vm8, %v3069_v36  ;;  %v2104_v36 = vld [vmem:[%s3517_s12 + $0x1] ss:$0 sm:$0xff] }
 0xb7c   :  { %v1793_v32 = vadd.f32 %v2104_v36, %v1784_v25  ;;  %v1792_v55 = vadd.f32 %v2104_v36, %v1781_v37 }
 0xb7e   :  { %v1797_v44 = vmul.f32 0.01, %v1793_v32  ;;  %vm1795_vm7 = vcmp.gt.f32.partialorder %v1793_v32, 0.0  ;;  %v1796_v63 = vmul.f32 0.01, %v1792_v55  ;;  %vm1794_vm8 = vcmp.gt.f32.partialorder %v1792_v55, 0.0 }
 0xb80   :  { %v1799_v54 = vsel %vm1795_vm7, %v1793_v32, %v1797_v44  ;;  %v1798_v40 = vsel %vm1794_vm8, %v1792_v55, %v1796_v63 }
 0xbf6   :  { %v1850_v19 = vpop.f32.mrf.mxu2 }
 0xbf7   :  { %1858 = vrot.lane.b32.xlu0 %v1850_v19, %s2194_s6 }
 0xbfe   :  { %v1853_v35 = vpop.f32.mrf.mxu2 }
 0xbff   :  { %1860 = vrot.lane.b32.xlu1 %v1853_v35, %s2194_s6 }
 0xc69   :  { %v1859_v33 = vpop.permute.xlu0 %1858 }
 0xc6a   :  { %v1864_v45 = vsub.f32 %v1802_v20, %v1859_v33 }
 0xc6c   :  { %v1866_v48 = vmul.f32 1.442695, %v1864_v45 }
 0xc6e   :  { %2112 = vpow2.f32 %v1866_v48 }
 0xc71   :  { %v1861_v51 = vpop.permute.xlu1 %1860 }
 0xc72   :  { %v1865_v31 = vsub.f32 %v1803_v46, %v1861_v51 }
 0xc74   :  { %v2113_v21 = vpop.eup %2112  ;;  %v1868_v12 = vmul.f32 1.442695, %v1865_v31 }
 0xc75   :  { %1872 = vperm.xlu1 %2096, %v2113_v21  }
 0xc76   :  { %2114 = vpow2.f32 %v1868_v12 }
 0xc7c   :  { %v2115_v10 = vpop.eup %2114 }
 0xc7d   :  { %1877 = vperm.xlu2 %2097, %v2115_v10  }
 0xc85   :  { %1924 = vrot.lane.b32.xlu2 %v3055_v1, %s2194_s6  ;;  %s1991_s6 = sshll.u32 %s2201_s18, 4  ;;  %s1992_s6 = int_to_ptr.vmem [resolvable:$true] %s1991_s6 }
 0xcd7   :  { %v1878_v47 = vpop.permute.xlu2 %1877 }
 0xcd8   :  { %v1881_v16 = vmul.f32 %v1878_v47, %v1799_v54 }
 0xcda   :  { %v1883_v42 = vsel %vm90_vm0, %v1881_v16, %v2115_v10 }
 0xcdb   :  { %1898 = vmatpush.msra.mxu0 %v1883_v42 }
 0xcdf   :  { %v1925_v57 = vpop.permute.xlu2 %1924 }
 0xce7   :  { %v1873_v43 = vpop.permute.xlu1 %1872 }
 0xce8   :  { %v1880_v14 = vmul.f32 %v1873_v43, %v1798_v40 }
 0xcea   :  { %v1882_v29 = vsel %vm90_vm0, %v1880_v14, %v2113_v21 }
 0xceb   :  { %1899 = vmatpush.msra.mxu0 %v1882_v29 }
 0xcec   :  { %2067 = vmatmul.msk.f32.vlgmr.msra.gmra.mxu0 %vm152_vm2, %v2125_v23 }
 0xd69   :  { %v1901_v9 = vpop.f32.mrf.mxu0 }
 0xd6a   :  { %1906 = vperm.xlu0 %2095, %v1901_v9  }
 0xddc   :  { %v1907_v39 = vpop.permute.xlu0 %1906 }
 0xddd   :  { %2116 = vrcp.f32 %v1907_v39  ;;  %v1920_v25 = vand.u32 2147483648, %v1907_v39  ;;  %v1918_v27 = vand.u32 2147483647, %v1907_v39  ;;  %vm1914_vm13 = vweird.f32 %v1907_v39 }
 0xddf   :  { %v1921_v0 = vor.u32 1.1754944e-38, %v1920_v25  ;;  %vm1919_vm5 = vcmp.eq.f32.partialorder %v1918_v27, 8.507059e+37 }
 0xde3   :  { %v2117_v37 = vpop.eup %2116 }
 0xde4   :  { %v1910_v24 = vmul.f32 %v2117_v37, %v1907_v39  ;;  %vm1915_vm2 = vweird.f32 %v2117_v37 }
 0xde5   :  { %vm1916_vm3 = vmor %vm1914_vm13, %vm1915_vm2 }
 0xde6   :  { %v1911_v20 = vsub.f32 1.0, %v1910_v24 }
 0xde8   :  { %v1912_v13 = vmul.f32 %v2117_v37, %v1911_v20 }
 0xdea   :  { %v1913_v46 = vadd.f32 %v2117_v37, %v1912_v13 }
 0xdec   :  { %v1917_v58 = vsel %vm1916_vm3, %v2117_v37, %v1913_v46 }
 0xded   :  { %v1922_v52 = vsel %vm1919_vm5, %v1921_v0, %v1917_v58 }
 0xdee   :  { %v1923_v53 = vmul.f32 %v1922_v52, %v1901_v9 }
 0xdf0   :  { %v1927_v15 = vsel %vm90_vm0, %v1923_v53, %v1925_v57 }
 0xdf1   :  { %2077 = vmatmul.msk.f32.vlgmr.msra.gmra.mxu3 %vm785_vm9, %v1927_v15  ;;  %vm1971_vm9 = vcmask 254976  }
 0xe74   :  { %v1962_v28 = vpop.f32.mrf.mxu3 }
 0xe75   :  { %v1963_v4 = vadd.f32 %v2105_v60, %v1962_v28 }
 0xe77   :  { %vm1965_vm0 = vcmp.gt.f32.partialorder %v1963_v4, 0.0  ;;  %v1966_v3 = vmul.f32 0.01, %v1963_v4 }
 0xe79   :  { %v1967_v8 = vsel %vm1965_vm0, %v1963_v4, %v1966_v3 }
 0xe7a   :  { %v1968_v2 = vadd.f32 %v1967_v8, %v3055_v1 }
 0xe7c   :  { %1972 = vst.msk [vmem:[#allocation6] sm:$0x3] %vm1971_vm9, %v1968_v2 }
 0xe7d   :  { %1996 = dma.vmem_to_hbm [thread:$0]  %s1992_s6, 32, %s1994_s16, [#allocation7]  }
 0xe7e   :  { %2188 = dma.done.wait [#allocation3], 256  }
 0xe7f   :  { %2189 = vsyncadd [#allocation3], 4294967040 }
 0xe80   :  { %2190 = dma.done.wait [#allocation7], 32  }
 0xe81   :  { %2191 = vsyncadd [#allocation7], 4294967264 }
 0xe82   :  { %2005 = vsyncpa [#allocation3], 1 }
 0xe83   :  { %2006 = vsyncpa [#allocation7], 1 }
 0xe84   :  { %2007 = vsyncpa [#allocation4], 1 }

</bundles_post_ra>
